<compile_context>
chip_gen: v5e
topology: v5e:2x2
jax: 0.10.0
libtpu: 0.0.40
codegen_flags: <defaults>
</compile_context>

<pallas_src>
import functools

import jax
import jax.numpy as jnp
from jax.experimental import pallas as pl
from jax.experimental.pallas import tpu as pltpu


def _round_up(v, m):
    return ((v + m - 1) // m) * m


def _apply_act(v, act):
    if act == "relu":
        return jnp.maximum(v, 0.0)
    if act == "tanh":
        return jnp.tanh(v)
    if act == "none":
        return v
    raise NameError("activation does not exist")


# ---------------------------------------------------------------------------
# Pallas kernels
# ---------------------------------------------------------------------------
def _conv_act_pool_kernel(p_ref, w_ref, b_ref, o_ref, *, act):
    """Fused conv(im2col matmul) + bias + activation + 2x2 maxpool.

    p_ref: (4, Kp, mt) bf16 -- im2col^T, one slab per (dh, dw) pool offset.
    w_ref: (OCp, Kp) bf16 flattened conv weight; b_ref: (OCp, 1) f32 bias.
    o_ref: (OCp, mt) f32 -- pooled output, output positions lane-dense.
    """
    w = w_ref[...]
    b = b_ref[...]
    res = None
    for d in range(4):  # static unroll over the 4 pool-window offsets
        acc = jnp.dot(w, p_ref[d], preferred_element_type=jnp.float32) + b
        acc = _apply_act(acc, act)
        res = acc if res is None else jnp.maximum(res, acc)
    o_ref[...] = res


def _fc_block_kernel(x_ref, w1_ref, b1_ref, w2_ref, b2_ref, w3_ref, b3_ref,
                     o_ref, *, act):
    """Fused fc1 -> act -> fc2 -> act -> fc3; intermediates stay in VMEM/vregs."""
    h = jnp.dot(x_ref[...], w1_ref[...], preferred_element_type=jnp.float32)
    h = _apply_act(h + b1_ref[...], act).astype(jnp.bfloat16)
    h = jnp.dot(h, w2_ref[...], preferred_element_type=jnp.float32)
    h = _apply_act(h + b2_ref[...], act).astype(jnp.bfloat16)
    h = jnp.dot(h, w3_ref[...], preferred_element_type=jnp.float32)
    o_ref[...] = h + b3_ref[...]


# ---------------------------------------------------------------------------
# Conv stage wrapper: pool-aware im2col (XLA glue, ~hundreds of KB) + kernel
# ---------------------------------------------------------------------------
def _pool_im2col(x, KH, KW):
    """x: (N,C,H,W) f32 -> (4, C*KH*KW, N*PH*PW) bf16.

    Slab d = dh*2+dw holds the im2col columns of the conv-output positions
    (2*ph+dh, 2*pw+dw); column order k = c*KH*KW + kh*KW + kw matches torch's
    weight.reshape(OC, -1); m = n*PH*PW + ph*PW + pw.
    """
    N, C, H, W = x.shape
    OH, OW = H - KH + 1, W - KW + 1
    PH, PW = OH // 2, OW // 2
    xb = x.astype(jnp.bfloat16)
    taps = jnp.stack(
        [xb[:, :, kh:kh + OH, kw:kw + OW] for kh in range(KH) for kw in range(KW)],
        axis=2)                                         # (N, C, KH*KW, OH, OW)
    taps = taps[:, :, :, :2 * PH, :2 * PW]
    taps = taps.reshape(N, C, KH * KW, PH, 2, PW, 2)
    patches_t = taps.transpose(4, 6, 1, 2, 0, 3, 5)     # (dh, dw, C, tap, N, PH, PW)
    return patches_t.reshape(4, C * KH * KW, N * PH * PW), PH, PW


def conv_act_pool(x, wp, bp, act, *, m_tile=512):
    """Fused valid conv(5x5, stride 1) + activation + MaxPool2d(2,2), NCHW in.

    Returns ((OCp, N*PH*PW_pad) f32 with output positions on lanes, PH, PW, M).
    """
    N, C, H, W = x.shape
    KH = KW = 5
    OCp, Kp = wp.shape
    K = C * KH * KW
    patches_t, PH, PW = _pool_im2col(x, KH, KW)
    M = N * PH * PW
    Mp = _round_up(M, 128)
    patches_t = jnp.pad(patches_t, ((0, 0), (0, Kp - K), (0, Mp - M)))

    # Lane-axis tile: big enough to amortize per-step overhead, small enough to
    # keep double-buffered blocks well inside v7x's 64 MiB VMEM as batch grows.
    mt = m_tile
    while Mp % mt:
        mt //= 2
    grid = (Mp // mt,)

    out = pl.pallas_call(
        functools.partial(_conv_act_pool_kernel, act=act),
        out_shape=jax.ShapeDtypeStruct((OCp, Mp), jnp.float32),
        grid=grid,
        in_specs=[
            pl.BlockSpec((4, Kp, mt), lambda m: (0, 0, m)),
            pl.BlockSpec((OCp, Kp), lambda m: (0, 0)),
            pl.BlockSpec((OCp, 1), lambda m: (0, 0)),
        ],
        out_specs=pl.BlockSpec((OCp, mt), lambda m: (0, m)),
        compiler_params=pltpu.CompilerParams(
            dimension_semantics=("parallel",),
            vmem_limit_bytes=32 * 1024 * 1024),
    )(patches_t, wp, bp)
    return out, PH, PW, M


# ---------------------------------------------------------------------------
# Fused FC block wrapper
# ---------------------------------------------------------------------------
def fc_block(x, params, act):
    """x: (N, 400) f32 -> (N, 10) f32 via one fused kernel."""
    N, K = x.shape
    Kp = params["fc1_wp"].shape[0]          # 512
    NOp = params["fc3_wp"].shape[1]         # 128 (padded out-features)
    Np = _round_up(max(N, 8), 8)
    xp = jnp.zeros((Np, Kp), jnp.bfloat16).at[:N, :K].set(x.astype(jnp.bfloat16))
    out = pl.pallas_call(
        functools.partial(_fc_block_kernel, act=act),
        out_shape=jax.ShapeDtypeStruct((Np, NOp), jnp.float32),
        in_specs=[pl.BlockSpec(memory_space=pltpu.MemorySpace.VMEM)] * 7,
        out_specs=pl.BlockSpec(memory_space=pltpu.MemorySpace.VMEM),
        compiler_params=pltpu.CompilerParams(vmem_limit_bytes=32 * 1024 * 1024),
    )(xp, params["fc1_wp"], params["fc1_bp"],
      params["fc2_wp"], params["fc2_bp"],
      params["fc3_wp"], params["fc3_bp"])
    # TODO(synk): add a row-tiled grid here if batch grows beyond a few thousand.
    return out[:N, :10]


# ---------------------------------------------------------------------------
# Parameter init (mirrors the torch module's shapes/scales) + kernel-ready prep
# ---------------------------------------------------------------------------
def _prep_conv(w, b):
    """(OC,IC,5,5) torch weight -> (OCp, Kp) bf16 flattened/padded, bias (OCp,1) f32."""
    OC, IC, KH, KW = w.shape
    K = IC * KH * KW
    OCp, Kp = _round_up(OC, 8), _round_up(K, 128)
    wp = jnp.zeros((OCp, Kp), jnp.bfloat16).at[:OC, :K].set(
        w.reshape(OC, K).astype(jnp.bfloat16))
    bp = jnp.zeros((OCp, 1), jnp.float32).at[:OC, 0].set(b)
    return wp, bp


def _prep_fc(w, b, kp, np_out):
    """(out,in) torch weight -> pre-transposed (kp, np_out) bf16, bias (1, np_out) f32."""
    out_f, in_f = w.shape
    wp = jnp.zeros((kp, np_out), jnp.bfloat16).at[:in_f, :out_f].set(
        w.T.astype(jnp.bfloat16))
    bp = jnp.zeros((1, np_out), jnp.float32).at[0, :out_f].set(b)
    return wp, bp


def init_params(key, alpha=2.0, g=1.5):
    # TODO(synk): scipy.stats.levy_stable has no JAX equivalent for alpha<2;
    # for alpha=2, levy_stable(scale=c) == Normal(std=sqrt(2)*c), used here.
    ks = jax.random.split(key, 10)

    def levy_w(k, shape, n_eff):
        scale = g * (0.5 / n_eff) ** (1.0 / alpha)
        return (scale * (2.0 ** 0.5)) * jax.random.normal(k, shape, jnp.float32)

    def bias(k, fan_in, n):
        bound = 1.0 / (fan_in ** 0.5)        # torch default bias init
        return jax.random.uniform(k, (n,), jnp.float32, -bound, bound)

    # Fan definitions mirror the torch module exactly:
    #   conv: N_eff = sqrt(kernel_size[0]**2 * in_channels)   (square kernels here)
    #   linear: N_eff = sqrt(out_features * in_features)
    conv1_w = levy_w(ks[0], (6, 3, 5, 5), (5 ** 2 * 3) ** 0.5)
    conv1_b = bias(ks[1], 3 * 25, 6)
    conv2_w = levy_w(ks[2], (16, 6, 5, 5), (5 ** 2 * 6) ** 0.5)
    conv2_b = bias(ks[3], 6 * 25, 16)
    fc1_w = levy_w(ks[4], (120, 400), (120 * 400) ** 0.5)
    fc1_b = bias(ks[5], 400, 120)
    fc2_w = levy_w(ks[6], (84, 120), (84 * 120) ** 0.5)
    fc2_b = bias(ks[7], 120, 84)
    fc3_w = levy_w(ks[8], (10, 84), (10 * 84) ** 0.5)
    fc3_b = bias(ks[9], 84, 10)

    c1w, c1b = _prep_conv(conv1_w, conv1_b)            # (8, 128)
    c2w, c2b = _prep_conv(conv2_w, conv2_b)            # (16, 256)
    f1w, f1b = _prep_fc(fc1_w, fc1_b, kp=512, np_out=128)
    f2w, f2b = _prep_fc(fc2_w, fc2_b, kp=128, np_out=128)
    f3w, f3b = _prep_fc(fc3_w, fc3_b, kp=128, np_out=128)
    return {
        "conv1_wp": c1w, "conv1_bp": c1b,
        "conv2_wp": c2w, "conv2_bp": c2b,
        "fc1_wp": f1w, "fc1_bp": f1b,
        "fc2_wp": f2w, "fc2_bp": f2b,
        "fc3_wp": f3w, "fc3_bp": f3b,
    }


# ---------------------------------------------------------------------------
# Forward pass (mirrors CONVNET_simple.forward)
# ---------------------------------------------------------------------------
def convnet_simple_forward(params, x, activation="relu"):
    N = x.shape[0]
    # stage 1: pool(act(conv1(x)))  -> (8, N*14*14) in (oc, n, ph, pw) order
    y1, PH1, PW1, M1 = conv_act_pool(
        x, params["conv1_wp"], params["conv1_bp"], activation)
    # tiny (~40 KB) relayout back to NCHW for the next stage's im2col
    x2 = y1[:6, :M1].reshape(6, N, PH1, PW1).transpose(1, 0, 2, 3)
    # stage 2: pool(act(conv2(x)))  -> (16, N*5*5)
    y2, PH2, PW2, M2 = conv_act_pool(
        x2, params["conv2_wp"], params["conv2_bp"], activation)
    # torch.flatten(x, 1): per-sample (C, H, W) order
    x_fc = (y2[:16, :M2].reshape(16, N, PH2 * PW2)
            .transpose(1, 0, 2).reshape(N, 16 * PH2 * PW2))
    # stage 3: fused fc1 -> act -> fc2 -> act -> fc3
    return fc_block(x_fc, params, activation)


if __name__ == "__main__":
    key = jax.random.PRNGKey(0)
    k_param, k_x = jax.random.split(key)
    params = init_params(k_param, alpha=2.0, g=1.5)
    # Input must be (N, 3, 32, 32) for the 16*5*5 flatten to line up (CIFAR-size).
    x = jax.random.normal(k_x, (2, 3, 32, 32), jnp.float32)

    fwd = jax.jit(functools.partial(convnet_simple_forward, activation="relu"))
    out = jax.block_until_ready(fwd(params, x))
    assert out.shape == (2, 10)
    print("KERNEL_OK")
</pallas_src>

<mosaic_0001>
module attributes {stable_mosaic.version = 11 : i64} {
  func.func @_conv_act_pool_kernel(%arg0: i32, %arg1: memref<4x128x512xbf16, #tpu.memory_space<vmem>>, %arg2: memref<8x128xbf16, #tpu.memory_space<vmem>>, %arg3: memref<8x1xf32, #tpu.memory_space<vmem>>, %arg4: memref<8x512xf32, #tpu.memory_space<vmem>>) attributes {dimension_semantics = [#tpu.dimension_semantics<parallel>], iteration_bounds = array<i64: 1>, scalar_prefetch = 0 : i64, scratch_operands = 0 : i64, tpu.core_type = #tpu.core_type<tc>, window_params = [{transform_indices = @transform_0, window_bounds = array<i64: 4, 128, 512>}, {pipeline_mode = #tpu.pipeline_mode<synchronous>, transform_indices = @transform_1, window_bounds = array<i64: 8, 128>}, {pipeline_mode = #tpu.pipeline_mode<synchronous>, transform_indices = @transform_2, window_bounds = array<i64: 8, 1>}, {transform_indices = @transform_3, window_bounds = array<i64: 8, 512>}]} {
    %c0 = arith.constant 0 : index
    %c0_0 = arith.constant 0 : index
    %0 = vector.load %arg2[%c0, %c0_0] : memref<8x128xbf16, #tpu.memory_space<vmem>>, vector<8x128xbf16>
    %c0_1 = arith.constant 0 : index
    %c0_2 = arith.constant 0 : index
    %1 = vector.load %arg3[%c0_1, %c0_2] : memref<8x1xf32, #tpu.memory_space<vmem>>, vector<8x1xf32>
    %c0_3 = arith.constant 0 : index
    %c0_4 = arith.constant 0 : index
    %c0_5 = arith.constant 0 : index
    %2 = vector.load %arg1[%c0_3, %c0_4, %c0_5] : memref<4x128x512xbf16, #tpu.memory_space<vmem>>, vector<1x128x512xbf16>
    %3 = vector.shape_cast %2 : vector<1x128x512xbf16> to vector<128x512xbf16>
    %cst = arith.constant dense<0.000000e+00> : vector<8x512xf32>
    %4 = tpu.matmul %0, %3, %cst {dimension_numbers = #tpu.dot_dimension_numbers<[1], [0], [0], [1], [0, 0, 1, 1], [], []>} : vector<8x128xbf16>, vector<128x512xbf16>, vector<8x512xf32> -> vector<8x512xf32>
    %5 = vector.broadcast %1 : vector<8x1xf32> to vector<8x512xf32>
    %6 = arith.addf %4, %5 : vector<8x512xf32>
    %cst_6 = arith.constant 0.000000e+00 : f32
    %7 = vector.broadcast %cst_6 : f32 to vector<8x512xf32>
    %8 = arith.maximumf %6, %7 : vector<8x512xf32>
    %c1 = arith.constant 1 : index
    %c0_7 = arith.constant 0 : index
    %c0_8 = arith.constant 0 : index
    %9 = vector.load %arg1[%c1, %c0_7, %c0_8] : memref<4x128x512xbf16, #tpu.memory_space<vmem>>, vector<1x128x512xbf16>
    %10 = vector.shape_cast %9 : vector<1x128x512xbf16> to vector<128x512xbf16>
    %cst_9 = arith.constant dense<0.000000e+00> : vector<8x512xf32>
    %11 = tpu.matmul %0, %10, %cst_9 {dimension_numbers = #tpu.dot_dimension_numbers<[1], [0], [0], [1], [0, 0, 1, 1], [], []>} : vector<8x128xbf16>, vector<128x512xbf16>, vector<8x512xf32> -> vector<8x512xf32>
    %12 = vector.broadcast %1 : vector<8x1xf32> to vector<8x512xf32>
    %13 = arith.addf %11, %12 : vector<8x512xf32>
    %cst_10 = arith.constant 0.000000e+00 : f32
    %14 = vector.broadcast %cst_10 : f32 to vector<8x512xf32>
    %15 = arith.maximumf %13, %14 : vector<8x512xf32>
    %16 = arith.maximumf %8, %15 : vector<8x512xf32>
    %c2 = arith.constant 2 : index
    %c0_11 = arith.constant 0 : index
    %c0_12 = arith.constant 0 : index
    %17 = vector.load %arg1[%c2, %c0_11, %c0_12] : memref<4x128x512xbf16, #tpu.memory_space<vmem>>, vector<1x128x512xbf16>
    %18 = vector.shape_cast %17 : vector<1x128x512xbf16> to vector<128x512xbf16>
    %cst_13 = arith.constant dense<0.000000e+00> : vector<8x512xf32>
    %19 = tpu.matmul %0, %18, %cst_13 {dimension_numbers = #tpu.dot_dimension_numbers<[1], [0], [0], [1], [0, 0, 1, 1], [], []>} : vector<8x128xbf16>, vector<128x512xbf16>, vector<8x512xf32> -> vector<8x512xf32>
    %20 = vector.broadcast %1 : vector<8x1xf32> to vector<8x512xf32>
    %21 = arith.addf %19, %20 : vector<8x512xf32>
    %cst_14 = arith.constant 0.000000e+00 : f32
    %22 = vector.broadcast %cst_14 : f32 to vector<8x512xf32>
    %23 = arith.maximumf %21, %22 : vector<8x512xf32>
    %24 = arith.maximumf %16, %23 : vector<8x512xf32>
    %c3 = arith.constant 3 : index
    %c0_15 = arith.constant 0 : index
    %c0_16 = arith.constant 0 : index
    %25 = vector.load %arg1[%c3, %c0_15, %c0_16] : memref<4x128x512xbf16, #tpu.memory_space<vmem>>, vector<1x128x512xbf16>
    %26 = vector.shape_cast %25 : vector<1x128x512xbf16> to vector<128x512xbf16>
    %cst_17 = arith.constant dense<0.000000e+00> : vector<8x512xf32>
    %27 = tpu.matmul %0, %26, %cst_17 {dimension_numbers = #tpu.dot_dimension_numbers<[1], [0], [0], [1], [0, 0, 1, 1], [], []>} : vector<8x128xbf16>, vector<128x512xbf16>, vector<8x512xf32> -> vector<8x512xf32>
    %28 = vector.broadcast %1 : vector<8x1xf32> to vector<8x512xf32>
    %29 = arith.addf %27, %28 : vector<8x512xf32>
    %cst_18 = arith.constant 0.000000e+00 : f32
    %30 = vector.broadcast %cst_18 : f32 to vector<8x512xf32>
    %31 = arith.maximumf %29, %30 : vector<8x512xf32>
    %32 = arith.maximumf %24, %31 : vector<8x512xf32>
    %c0_19 = arith.constant 0 : index
    %c0_20 = arith.constant 0 : index
    %33 = vector.load %arg4[%c0_19, %c0_20] : memref<8x512xf32, #tpu.memory_space<vmem>>, vector<8x512xf32>
    tpu.vector_store %arg4[%c0_19, %c0_20], %32 {strides = array<i32>} : memref<8x512xf32, #tpu.memory_space<vmem>>, vector<8x512xf32>,
    return
  }
  func.func @transform_0(%arg0: i32) -> (i32, i32, i32) {
    %c0_i32 = arith.constant 0 : i32
    %c0_i32_0 = arith.constant 0 : i32
    %c0_i32_1 = arith.constant 0 : i32
    return %c0_i32, %c0_i32_0, %arg0 : i32, i32, i32
  }
  func.func @transform_1(%arg0: i32) -> (i32, i32) {
    %c0_i32 = arith.constant 0 : i32
    %c0_i32_0 = arith.constant 0 : i32
    %c0_i32_1 = arith.constant 0 : i32
    return %c0_i32, %c0_i32_0 : i32, i32
  }
  func.func @transform_2(%arg0: i32) -> (i32, i32) {
    %c0_i32 = arith.constant 0 : i32
    %c0_i32_0 = arith.constant 0 : i32
    %c0_i32_1 = arith.constant 0 : i32
    return %c0_i32, %c0_i32_0 : i32, i32
  }
  func.func @transform_3(%arg0: i32) -> (i32, i32) {
    %c0_i32 = arith.constant 0 : i32
    %c0_i32_0 = arith.constant 0 : i32
    return %c0_i32, %arg0 : i32, i32
  }
}

module attributes {stable_mosaic.version = 11 : i64} {
  func.func @_conv_act_pool_kernel(%arg0: i32, %arg1: memref<4x256x128xbf16, #tpu.memory_space<vmem>>, %arg2: memref<16x256xbf16, #tpu.memory_space<vmem>>, %arg3: memref<16x1xf32, #tpu.memory_space<vmem>>, %arg4: memref<16x128xf32, #tpu.memory_space<vmem>>) attributes {dimension_semantics = [#tpu.dimension_semantics<parallel>], iteration_bounds = array<i64: 1>, scalar_prefetch = 0 : i64, scratch_operands = 0 : i64, tpu.core_type = #tpu.core_type<tc>, window_params = [{transform_indices = @transform_0, window_bounds = array<i64: 4, 256, 128>}, {pipeline_mode = #tpu.pipeline_mode<synchronous>, transform_indices = @transform_1, window_bounds = array<i64: 16, 256>}, {pipeline_mode = #tpu.pipeline_mode<synchronous>, transform_indices = @transform_2, window_bounds = array<i64: 16, 1>}, {transform_indices = @transform_3, window_bounds = array<i64: 16, 128>}]} {
    %c0 = arith.constant 0 : index
    %c0_0 = arith.constant 0 : index
    %0 = vector.load %arg2[%c0, %c0_0] : memref<16x256xbf16, #tpu.memory_space<vmem>>, vector<16x256xbf16>
    %c0_1 = arith.constant 0 : index
    %c0_2 = arith.constant 0 : index
    %1 = vector.load %arg3[%c0_1, %c0_2] : memref<16x1xf32, #tpu.memory_space<vmem>>, vector<16x1xf32>
    %c0_3 = arith.constant 0 : index
    %c0_4 = arith.constant 0 : index
    %c0_5 = arith.constant 0 : index
    %2 = vector.load %arg1[%c0_3, %c0_4, %c0_5] : memref<4x256x128xbf16, #tpu.memory_space<vmem>>, vector<1x256x128xbf16>
    %3 = vector.shape_cast %2 : vector<1x256x128xbf16> to vector<256x128xbf16>
    %cst = arith.constant dense<0.000000e+00> : vector<16x128xf32>
    %4 = tpu.matmul %0, %3, %cst {dimension_numbers = #tpu.dot_dimension_numbers<[1], [0], [0], [1], [0, 0, 1, 1], [], []>} : vector<16x256xbf16>, vector<256x128xbf16>, vector<16x128xf32> -> vector<16x128xf32>
    %5 = vector.broadcast %1 : vector<16x1xf32> to vector<16x128xf32>
    %6 = arith.addf %4, %5 : vector<16x128xf32>
    %cst_6 = arith.constant 0.000000e+00 : f32
    %7 = vector.broadcast %cst_6 : f32 to vector<16x128xf32>
    %8 = arith.maximumf %6, %7 : vector<16x128xf32>
    %c1 = arith.constant 1 : index
    %c0_7 = arith.constant 0 : index
    %c0_8 = arith.constant 0 : index
    %9 = vector.load %arg1[%c1, %c0_7, %c0_8] : memref<4x256x128xbf16, #tpu.memory_space<vmem>>, vector<1x256x128xbf16>
    %10 = vector.shape_cast %9 : vector<1x256x128xbf16> to vector<256x128xbf16>
    %cst_9 = arith.constant dense<0.000000e+00> : vector<16x128xf32>
    %11 = tpu.matmul %0, %10, %cst_9 {dimension_numbers = #tpu.dot_dimension_numbers<[1], [0], [0], [1], [0, 0, 1, 1], [], []>} : vector<16x256xbf16>, vector<256x128xbf16>, vector<16x128xf32> -> vector<16x128xf32>
    %12 = vector.broadcast %1 : vector<16x1xf32> to vector<16x128xf32>
    %13 = arith.addf %11, %12 : vector<16x128xf32>
    %cst_10 = arith.constant 0.000000e+00 : f32
    %14 = vector.broadcast %cst_10 : f32 to vector<16x128xf32>
    %15 = arith.maximumf %13, %14 : vector<16x128xf32>
    %16 = arith.maximumf %8, %15 : vector<16x128xf32>
    %c2 = arith.constant 2 : index
    %c0_11 = arith.constant 0 : index
    %c0_12 = arith.constant 0 : index
    %17 = vector.load %arg1[%c2, %c0_11, %c0_12] : memref<4x256x128xbf16, #tpu.memory_space<vmem>>, vector<1x256x128xbf16>
    %18 = vector.shape_cast %17 : vector<1x256x128xbf16> to vector<256x128xbf16>
    %cst_13 = arith.constant dense<0.000000e+00> : vector<16x128xf32>
    %19 = tpu.matmul %0, %18, %cst_13 {dimension_numbers = #tpu.dot_dimension_numbers<[1], [0], [0], [1], [0, 0, 1, 1], [], []>} : vector<16x256xbf16>, vector<256x128xbf16>, vector<16x128xf32> -> vector<16x128xf32>
    %20 = vector.broadcast %1 : vector<16x1xf32> to vector<16x128xf32>
    %21 = arith.addf %19, %20 : vector<16x128xf32>
    %cst_14 = arith.constant 0.000000e+00 : f32
    %22 = vector.broadcast %cst_14 : f32 to vector<16x128xf32>
    %23 = arith.maximumf %21, %22 : vector<16x128xf32>
    %24 = arith.maximumf %16, %23 : vector<16x128xf32>
    %c3 = arith.constant 3 : index
    %c0_15 = arith.constant 0 : index
    %c0_16 = arith.constant 0 : index
    %25 = vector.load %arg1[%c3, %c0_15, %c0_16] : memref<4x256x128xbf16, #tpu.memory_space<vmem>>, vector<1x256x128xbf16>
    %26 = vector.shape_cast %25 : vector<1x256x128xbf16> to vector<256x128xbf16>
    %cst_17 = arith.constant dense<0.000000e+00> : vector<16x128xf32>
    %27 = tpu.matmul %0, %26, %cst_17 {dimension_numbers = #tpu.dot_dimension_numbers<[1], [0], [0], [1], [0, 0, 1, 1], [], []>} : vector<16x256xbf16>, vector<256x128xbf16>, vector<16x128xf32> -> vector<16x128xf32>
    %28 = vector.broadcast %1 : vector<16x1xf32> to vector<16x128xf32>
    %29 = arith.addf %27, %28 : vector<16x128xf32>
    %cst_18 = arith.constant 0.000000e+00 : f32
    %30 = vector.broadcast %cst_18 : f32 to vector<16x128xf32>
    %31 = arith.maximumf %29, %30 : vector<16x128xf32>
    %32 = arith.maximumf %24, %31 : vector<16x128xf32>
    %c0_19 = arith.constant 0 : index
    %c0_20 = arith.constant 0 : index
    %33 = vector.load %arg4[%c0_19, %c0_20] : memref<16x128xf32, #tpu.memory_space<vmem>>, vector<16x128xf32>
    tpu.vector_store %arg4[%c0_19, %c0_20], %32 {strides = array<i32>} : memref<16x128xf32, #tpu.memory_space<vmem>>, vector<16x128xf32>,
    return
  }
  func.func @transform_0(%arg0: i32) -> (i32, i32, i32) {
    %c0_i32 = arith.constant 0 : i32
    %c0_i32_0 = arith.constant 0 : i32
    %c0_i32_1 = arith.constant 0 : i32
    return %c0_i32, %c0_i32_0, %arg0 : i32, i32, i32
  }
  func.func @transform_1(%arg0: i32) -> (i32, i32) {
    %c0_i32 = arith.constant 0 : i32
    %c0_i32_0 = arith.constant 0 : i32
    %c0_i32_1 = arith.constant 0 : i32
    return %c0_i32, %c0_i32_0 : i32, i32
  }
  func.func @transform_2(%arg0: i32) -> (i32, i32) {
    %c0_i32 = arith.constant 0 : i32
    %c0_i32_0 = arith.constant 0 : i32
    %c0_i32_1 = arith.constant 0 : i32
    return %c0_i32, %c0_i32_0 : i32, i32
  }
  func.func @transform_3(%arg0: i32) -> (i32, i32) {
    %c0_i32 = arith.constant 0 : i32
    %c0_i32_0 = arith.constant 0 : i32
    return %c0_i32, %arg0 : i32, i32
  }
}

module attributes {stable_mosaic.version = 11 : i64} {
  func.func @_fc_block_kernel(%arg0: memref<8x512xbf16, #tpu.memory_space<vmem>>, %arg1: memref<512x128xbf16, #tpu.memory_space<vmem>>, %arg2: memref<1x128xf32, #tpu.memory_space<vmem>>, %arg3: memref<128x128xbf16, #tpu.memory_space<vmem>>, %arg4: memref<1x128xf32, #tpu.memory_space<vmem>>, %arg5: memref<128x128xbf16, #tpu.memory_space<vmem>>, %arg6: memref<1x128xf32, #tpu.memory_space<vmem>>, %arg7: memref<8x128xf32, #tpu.memory_space<vmem>>) attributes {dimension_semantics = [], scalar_prefetch = 0 : i64, scratch_operands = 0 : i64, tpu.core_type = #tpu.core_type<tc>} {
    %c0 = arith.constant 0 : index
    %c0_0 = arith.constant 0 : index
    %0 = vector.load %arg0[%c0, %c0_0] : memref<8x512xbf16, #tpu.memory_space<vmem>>, vector<8x512xbf16>
    %c0_1 = arith.constant 0 : index
    %c0_2 = arith.constant 0 : index
    %1 = vector.load %arg1[%c0_1, %c0_2] : memref<512x128xbf16, #tpu.memory_space<vmem>>, vector<512x128xbf16>
    %cst = arith.constant dense<0.000000e+00> : vector<8x128xf32>
    %2 = tpu.matmul %0, %1, %cst {dimension_numbers = #tpu.dot_dimension_numbers<[1], [0], [0], [1], [0, 0, 1, 1], [], []>} : vector<8x512xbf16>, vector<512x128xbf16>, vector<8x128xf32> -> vector<8x128xf32>
    %c0_3 = arith.constant 0 : index
    %c0_4 = arith.constant 0 : index
    %3 = vector.load %arg2[%c0_3, %c0_4] : memref<1x128xf32, #tpu.memory_space<vmem>>, vector<1x128xf32>
    %4 = vector.broadcast %3 : vector<1x128xf32> to vector<8x128xf32>
    %5 = arith.addf %2, %4 : vector<8x128xf32>
    %cst_5 = arith.constant 0.000000e+00 : f32
    %6 = vector.broadcast %cst_5 : f32 to vector<8x128xf32>
    %7 = arith.maximumf %5, %6 : vector<8x128xf32>
    %8 = arith.truncf %7 : vector<8x128xf32> to vector<8x128xbf16>
    %c0_6 = arith.constant 0 : index
    %c0_7 = arith.constant 0 : index
    %9 = vector.load %arg3[%c0_6, %c0_7] : memref<128x128xbf16, #tpu.memory_space<vmem>>, vector<128x128xbf16>
    %cst_8 = arith.constant dense<0.000000e+00> : vector<8x128xf32>
    %10 = tpu.matmul %8, %9, %cst_8 {dimension_numbers = #tpu.dot_dimension_numbers<[1], [0], [0], [1], [0, 0, 1, 1], [], []>} : vector<8x128xbf16>, vector<128x128xbf16>, vector<8x128xf32> -> vector<8x128xf32>
    %c0_9 = arith.constant 0 : index
    %c0_10 = arith.constant 0 : index
    %11 = vector.load %arg4[%c0_9, %c0_10] : memref<1x128xf32, #tpu.memory_space<vmem>>, vector<1x128xf32>
    %12 = vector.broadcast %11 : vector<1x128xf32> to vector<8x128xf32>
    %13 = arith.addf %10, %12 : vector<8x128xf32>
    %cst_11 = arith.constant 0.000000e+00 : f32
    %14 = vector.broadcast %cst_11 : f32 to vector<8x128xf32>
    %15 = arith.maximumf %13, %14 : vector<8x128xf32>
    %16 = arith.truncf %15 : vector<8x128xf32> to vector<8x128xbf16>
    %c0_12 = arith.constant 0 : index
    %c0_13 = arith.constant 0 : index
    %17 = vector.load %arg5[%c0_12, %c0_13] : memref<128x128xbf16, #tpu.memory_space<vmem>>, vector<128x128xbf16>
    %cst_14 = arith.constant dense<0.000000e+00> : vector<8x128xf32>
    %18 = tpu.matmul %16, %17, %cst_14 {dimension_numbers = #tpu.dot_dimension_numbers<[1], [0], [0], [1], [0, 0, 1, 1], [], []>} : vector<8x128xbf16>, vector<128x128xbf16>, vector<8x128xf32> -> vector<8x128xf32>
    %c0_15 = arith.constant 0 : index
    %c0_16 = arith.constant 0 : index
    %19 = vector.load %arg6[%c0_15, %c0_16] : memref<1x128xf32, #tpu.memory_space<vmem>>, vector<1x128xf32>
    %20 = vector.broadcast %19 : vector<1x128xf32> to vector<8x128xf32>
    %21 = arith.addf %18, %20 : vector<8x128xf32>
    %c0_17 = arith.constant 0 : index
    %c0_18 = arith.constant 0 : index
    %22 = vector.load %arg7[%c0_17, %c0_18] : memref<8x128xf32, #tpu.memory_space<vmem>>, vector<8x128xf32>
    tpu.vector_store %arg7[%c0_17, %c0_18], %21 {strides = array<i32>} : memref<8x128xf32, #tpu.memory_space<vmem>>, vector<8x128xf32>,
    return
  }
}

</mosaic_0001>

<bundles_post_ra>
// kernel: convnet_simple_forward.3
= control target key start
LH: loop header
LB: loop body
LE: loop exit
PB: predicated region body
PF: predicated region fallthrough
CT: control target
= control target key end

     0   :  { %s2599_s0 = inlined_call_operand.vmem [shape: bf16[4,128,512], index: 0, kind: input, shape index: {}]   ;;  %s2600_s1 = inlined_call_operand.vmem [shape: bf16[8,128], index: 1, kind: input, shape index: {}]   ;;  %s2601_s2 = inlined_call_operand.vmem [shape: f32[8,1], index: 2, kind: input, shape index: {}]   ;;  %s2602_s3 = inlined_call_operand.vmem [shape: f32[8,512], index: 3, kind: output, shape index: {}]  }
   0x1   :  { %v1150_v0 = vld [vmem:[%s2599_s0 + $0xe0] sm:$0xf]  ;;  %v1674_v1 = vld [vmem:[%s2599_s0 + $0xec] sm:$0xf0]  ;;  %v1672_v2 = vld [vmem:[%s2599_s0 + $0xe4] sm:$0xf] }
   0x2   :  { %v1151_v3 = vor.u32 %v1674_v1, %v1150_v0  ;;  %v1152_v4 = vld [vmem:[%s2599_s0 + $0xf0] sm:$0xf0]  ;;  %v1158_v5 = vld [vmem:[%s2599_s0 + $0xe8] sm:$0xf]  ;;  %v1675_v6 = vld [vmem:[%s2599_s0 + $0xf4] sm:$0xf0] }
   0x3   :  { %v1155_v7 = vor.u32 %v1672_v2, %v1152_v4  ;;  %v1159_v8 = vor.u32 %v1675_v6, %v1158_v5  ;;  %v1673_v9 = vld [vmem:[%s2599_s0 + $0xec] sm:$0xf]  ;;  %v1160_v10 = vld [vmem:[%s2599_s0 + $0xf8] sm:$0xf0]  ;;  %v1134_v11 = vld [vmem:[%s2599_s0 + $0xc0] sm:$0xf] }
   0x4   :  { %213 = vmatpush.bf16.msra.mxu0 %v1151_v3  ;;  %v1163_v12 = vor.u32 %v1673_v9, %v1160_v10  ;;  %v1670_v13 = vld [vmem:[%s2599_s0 + $0xcc] sm:$0xf0]  ;;  %v1668_v14 = vld [vmem:[%s2599_s0 + $0xc4] sm:$0xf]  ;;  %v1136_v15 = vld [vmem:[%s2599_s0 + $0xd0] sm:$0xf0] }
   0x5   :  { %226 = vmatpush.bf16.msra.mxu1 %v1155_v7  ;;  %239 = vmatpush.bf16.msra.mxu2 %v1159_v8  ;;  %v1135_v16 = vor.u32 %v1670_v13, %v1134_v11  ;;  %v1139_v17 = vor.u32 %v1668_v14, %v1136_v15  ;;  %v1142_v18 = vld [vmem:[%s2599_s0 + $0xc8] sm:$0xf]  ;;  %v1671_v19 = vld [vmem:[%s2599_s0 + $0xd4] sm:$0xf0]  ;;  %v1669_v20 = vld [vmem:[%s2599_s0 + $0xcc] sm:$0xf] }
   0x6   :  { %252 = vmatpush.bf16.msra.mxu3 %v1163_v12  ;;  %v1143_v21 = vor.u32 %v1671_v19, %v1142_v18  ;;  %v1144_v22 = vld [vmem:[%s2599_s0 + $0xd8] sm:$0xf0]  ;;  %v1118_v23 = vld [vmem:[%s2599_s0 + $0xa0] sm:$0xf]  ;;  %v1666_v24 = vld [vmem:[%s2599_s0 + $0xac] sm:$0xf0] }
   0x7   :  { %v1147_v25 = vor.u32 %v1669_v20, %v1144_v22  ;;  %v1664_v26 = vld [vmem:[%s2599_s0 + $0xa4] sm:$0xf]  ;;  %v1120_v27 = vld [vmem:[%s2599_s0 + $0xb0] sm:$0xf0]  ;;  %v1126_v28 = vld [vmem:[%s2599_s0 + $0xa8] sm:$0xf]  ;;  %v1119_v29 = vor.u32 %v1666_v24, %v1118_v23 }
   0x8   :  { %214 = vmatpush.bf16.msra.mxu0 %v1135_v16  ;;  %v1667_v30 = vld [vmem:[%s2599_s0 + $0xb4] sm:$0xf0]  ;;  %v1665_v31 = vld [vmem:[%s2599_s0 + $0xac] sm:$0xf]  ;;  %v1128_v32 = vld [vmem:[%s2599_s0 + $0xb8] sm:$0xf0]  ;;  %v1123_v33 = vor.u32 %v1664_v26, %v1120_v27 }
   0x9   :  { %227 = vmatpush.bf16.msra.mxu1 %v1139_v17  ;;  %240 = vmatpush.bf16.msra.mxu2 %v1143_v21  ;;  %v1127_v34 = vor.u32 %v1667_v30, %v1126_v28  ;;  %v1102_v35 = vld [vmem:[%s2599_s0 + $0x80] sm:$0xf]  ;;  %v1662_v36 = vld [vmem:[%s2599_s0 + $0x8c] sm:$0xf0]  ;;  %v1660_v37 = vld [vmem:[%s2599_s0 + $0x84] sm:$0xf]  ;;  %v1131_v38 = vor.u32 %v1665_v31, %v1128_v32 }
   0xa   :  { %253 = vmatpush.bf16.msra.mxu3 %v1147_v25  ;;  %v1104_v39 = vld [vmem:[%s2599_s0 + $0x90] sm:$0xf0]  ;;  %v1110_v40 = vld [vmem:[%s2599_s0 + $0x88] sm:$0xf]  ;;  %v1663_v41 = vld [vmem:[%s2599_s0 + $0x94] sm:$0xf0]  ;;  %v1103_v44 = vor.u32 %v1662_v36, %v1102_v35 }
   0xb   :  { %v1661_v42 = vld [vmem:[%s2599_s0 + $0x8c] sm:$0xf]  ;;  %v1112_v43 = vld [vmem:[%s2599_s0 + $0x98] sm:$0xf0]  ;;  %v1107_v45 = vor.u32 %v1660_v37, %v1104_v39  ;;  %v1111_v46 = vor.u32 %v1663_v41, %v1110_v40  ;;  %v1086_v47 = vld [vmem:[%s2599_s0 + $0x60] sm:$0xf] }
   0xc   :  { %215 = vmatpush.bf16.msra.mxu0 %v1119_v29  ;;  %v1658_v48 = vld [vmem:[%s2599_s0 + $0x6c] sm:$0xf0]  ;;  %v1656_v49 = vld [vmem:[%s2599_s0 + $0x64] sm:$0xf]  ;;  %v1115_v50 = vor.u32 %v1661_v42, %v1112_v43  ;;  %v1088_v51 = vld [vmem:[%s2599_s0 + $0x70] sm:$0xf0] }
   0xd   :  { %228 = vmatpush.bf16.msra.mxu1 %v1123_v33  ;;  %241 = vmatpush.bf16.msra.mxu2 %v1127_v34  ;;  %v1094_v52 = vld [vmem:[%s2599_s0 + $0x68] sm:$0xf]  ;;  %v1659_v53 = vld [vmem:[%s2599_s0 + $0x74] sm:$0xf0]  ;;  %v1657_v54 = vld [vmem:[%s2599_s0 + $0x6c] sm:$0xf]  ;;  %v1087_v56 = vor.u32 %v1658_v48, %v1086_v47  ;;  %v1091_v57 = vor.u32 %v1656_v49, %v1088_v51 }
   0xe   :  { %254 = vmatpush.bf16.msra.mxu3 %v1131_v38  ;;  %v1096_v55 = vld [vmem:[%s2599_s0 + $0x78] sm:$0xf0]  ;;  %v1095_v58 = vor.u32 %v1659_v53, %v1094_v52  ;;  %v1070_v59 = vld [vmem:[%s2599_s0 + $0x40] sm:$0xf]  ;;  %v1654_v60 = vld [vmem:[%s2599_s0 + $0x4c] sm:$0xf0] }
   0xf   :  { %v1652_v61 = vld [vmem:[%s2599_s0 + $0x44] sm:$0xf]  ;;  %v1099_v62 = vor.u32 %v1657_v54, %v1096_v55  ;;  %v1072_v63 = vld [vmem:[%s2599_s0 + $0x50] sm:$0xf0]  ;;  %v1078_v0 = vld [vmem:[%s2599_s0 + $0x48] sm:$0xf]  ;;  %v1071_v4 = vor.u32 %v1654_v60, %v1070_v59 }
  0x10   :  { %216 = vmatpush.bf16.msra.mxu0 %v1103_v44  ;;  %v1655_v1 = vld [vmem:[%s2599_s0 + $0x54] sm:$0xf0]  ;;  %v1653_v2 = vld [vmem:[%s2599_s0 + $0x4c] sm:$0xf]  ;;  %v1080_v3 = vld [vmem:[%s2599_s0 + $0x58] sm:$0xf0]  ;;  %v1075_v5 = vor.u32 %v1652_v61, %v1072_v63 }
  0x11   :  { %229 = vmatpush.bf16.msra.mxu1 %v1107_v45  ;;  %242 = vmatpush.bf16.msra.mxu2 %v1111_v46  ;;  %v1079_v6 = vor.u32 %v1655_v1, %v1078_v0  ;;  %v1054_v7 = vld [vmem:[%s2599_s0 + $0x20] sm:$0xf]  ;;  %v1650_v8 = vld [vmem:[%s2599_s0 + $0x2c] sm:$0xf0]  ;;  %v1648_v9 = vld [vmem:[%s2599_s0 + $0x24] sm:$0xf]  ;;  %v1083_v10 = vor.u32 %v1653_v2, %v1080_v3 }
  0x12   :  { %255 = vmatpush.bf16.msra.mxu3 %v1115_v50  ;;  %v1056_v11 = vld [vmem:[%s2599_s0 + $0x30] sm:$0xf0]  ;;  %v1062_v12 = vld [vmem:[%s2599_s0 + $0x28] sm:$0xf]  ;;  %v1651_v13 = vld [vmem:[%s2599_s0 + $0x34] sm:$0xf0]  ;;  %v1055_v16 = vor.u32 %v1650_v8, %v1054_v7 }
  0x13   :  { %v1649_v14 = vld [vmem:[%s2599_s0 + $0x2c] sm:$0xf]  ;;  %v1064_v15 = vld [vmem:[%s2599_s0 + $0x38] sm:$0xf0]  ;;  %v1038_v17 = vld [vmem:[%s2599_s0] sm:$0xf]  ;;  %v1059_v19 = vor.u32 %v1648_v9, %v1056_v11  ;;  %v1063_v20 = vor.u32 %v1651_v13, %v1062_v12 }
  0x14   :  { %217 = vmatpush.bf16.msra.mxu0 %v1087_v56  ;;  %v1646_v18 = vld [vmem:[%s2599_s0 + $0xc] sm:$0xf0]  ;;  %v1644_v21 = vld [vmem:[%s2599_s0 + $0x4] sm:$0xf]  ;;  %v1040_v22 = vld [vmem:[%s2599_s0 + $0x10] sm:$0xf0]  ;;  %v1067_v24 = vor.u32 %v1649_v14, %v1064_v15 }
  0x15   :  { %230 = vmatpush.bf16.msra.mxu1 %v1091_v57  ;;  %243 = vmatpush.bf16.msra.mxu2 %v1095_v58  ;;  %v1046_v23 = vld [vmem:[%s2599_s0 + $0x8] sm:$0xf]  ;;  %v1647_v25 = vld [vmem:[%s2599_s0 + $0x14] sm:$0xf0]  ;;  %v1645_v26 = vld [vmem:[%s2599_s0 + $0xc] sm:$0xf]  ;;  %v1039_v31 = vor.u32 %v1646_v18, %v1038_v17  ;;  %v1043_v35 = vor.u32 %v1644_v21, %v1040_v22 }
  0x16   :  { %256 = vmatpush.bf16.msra.mxu3 %v1099_v62  ;;  %v1048_v27 = vld [vmem:[%s2599_s0 + $0x18] sm:$0xf0]  ;;  %v1310_v28 = vld [vmem:[%s2599_s0 + $0x1e0] sm:$0xf]  ;;  %v1706_v29 = vld [vmem:[%s2599_s0 + $0x1ec] sm:$0xf0]  ;;  %v1047_v36 = vor.u32 %v1647_v25, %v1046_v23 }
  0x17   :  { %v1704_v30 = vld [vmem:[%s2599_s0 + $0x1e4] sm:$0xf]  ;;  %v1312_v32 = vld [vmem:[%s2599_s0 + $0x1f0] sm:$0xf0]  ;;  %v1318_v33 = vld [vmem:[%s2599_s0 + $0x1e8] sm:$0xf]  ;;  %v1051_v39 = vor.u32 %v1645_v26, %v1048_v27  ;;  %v1311_v40 = vor.u32 %v1706_v29, %v1310_v28 }
  0x18   :  { %218 = vmatpush.bf16.msra.mxu0 %v1071_v4  ;;  %v1707_v34 = vld [vmem:[%s2599_s0 + $0x1f4] sm:$0xf0]  ;;  %v1705_v37 = vld [vmem:[%s2599_s0 + $0x1ec] sm:$0xf]  ;;  %v1320_v38 = vld [vmem:[%s2599_s0 + $0x1f8] sm:$0xf0]  ;;  %v1315_v41 = vor.u32 %v1704_v30, %v1312_v32 }
  0x19   :  { %231 = vmatpush.bf16.msra.mxu1 %v1075_v5  ;;  %244 = vmatpush.bf16.msra.mxu2 %v1079_v6  ;;  %v1319_v42 = vor.u32 %v1707_v34, %v1318_v33  ;;  %v1294_v43 = vld [vmem:[%s2599_s0 + $0x1c0] sm:$0xf]  ;;  %v1702_v44 = vld [vmem:[%s2599_s0 + $0x1cc] sm:$0xf0]  ;;  %v1700_v45 = vld [vmem:[%s2599_s0 + $0x1c4] sm:$0xf]  ;;  %v1323_v46 = vor.u32 %v1705_v37, %v1320_v38 }
  0x1a   :  { %257 = vmatpush.bf16.msra.mxu3 %v1083_v10  ;;  %v1296_v47 = vld [vmem:[%s2599_s0 + $0x1d0] sm:$0xf0]  ;;  %v1302_v48 = vld [vmem:[%s2599_s0 + $0x1c8] sm:$0xf]  ;;  %v1703_v49 = vld [vmem:[%s2599_s0 + $0x1d4] sm:$0xf0]  ;;  %v1295_v53 = vor.u32 %v1702_v44, %v1294_v43 }
  0x1b   :  { %v1701_v50 = vld [vmem:[%s2599_s0 + $0x1cc] sm:$0xf]  ;;  %v1304_v51 = vld [vmem:[%s2599_s0 + $0x1d8] sm:$0xf0]  ;;  %v2038_v52 = vld [vmem:[%s2600_s1] sm:$0xf]  ;;  %v1299_v54 = vor.u32 %v1700_v45, %v1296_v47  ;;  %v1303_v55 = vor.u32 %v1703_v49, %v1302_v48 }
  0x1c   :  { %219 = vmatpush.bf16.msra.mxu0 %v1055_v16  ;;  %v1278_v56 = vld [vmem:[%s2599_s0 + $0x1a0] sm:$0xf]  ;;  %v1698_v57 = vld [vmem:[%s2599_s0 + $0x1ac] sm:$0xf0]  ;;  %v1696_v58 = vld [vmem:[%s2599_s0 + $0x1a4] sm:$0xf]  ;;  %v1307_v59 = vor.u32 %v1701_v50, %v1304_v51 }
  0x1d   :  { %232 = vmatpush.bf16.msra.mxu1 %v1059_v19  ;;  %245 = vmatpush.bf16.msra.mxu2 %v1063_v20  ;;  %v1280_v60 = vld [vmem:[%s2599_s0 + $0x1b0] sm:$0xf0]  ;;  %v1286_v61 = vld [vmem:[%s2599_s0 + $0x1a8] sm:$0xf]  ;;  %v1699_v62 = vld [vmem:[%s2599_s0 + $0x1b4] sm:$0xf0]  ;;  %v1279_v1 = vor.u32 %v1698_v57, %v1278_v56 }
  0x1e   :  { %258 = vmatpush.bf16.msra.mxu3 %v1067_v24  ;;  %v1697_v63 = vld [vmem:[%s2599_s0 + $0x1ac] sm:$0xf]  ;;  %v1288_v0 = vld [vmem:[%s2599_s0 + $0x1b8] sm:$0xf0]  ;;  %v1283_v2 = vor.u32 %v1696_v58, %v1280_v60  ;;  %v1287_v3 = vor.u32 %v1699_v62, %v1286_v61  ;;  %v1262_v4 = vld [vmem:[%s2599_s0 + $0x180] sm:$0xf] }
  0x1f   :  { %v1694_v5 = vld [vmem:[%s2599_s0 + $0x18c] sm:$0xf0]  ;;  %v1692_v6 = vld [vmem:[%s2599_s0 + $0x184] sm:$0xf]  ;;  %v1291_v7 = vor.u32 %v1697_v63, %v1288_v0  ;;  %v1264_v8 = vld [vmem:[%s2599_s0 + $0x190] sm:$0xf0] }
  0x20   :  { %220 = vmatpush.bf16.msra.mxu0 %v1039_v31  ;;  %v1270_v9 = vld [vmem:[%s2599_s0 + $0x188] sm:$0xf]  ;;  %v1695_v10 = vld [vmem:[%s2599_s0 + $0x194] sm:$0xf0]  ;;  %v1693_v11 = vld [vmem:[%s2599_s0 + $0x18c] sm:$0xf]  ;;  %v1263_v13 = vor.u32 %v1694_v5, %v1262_v4  ;;  %v1267_v14 = vor.u32 %v1692_v6, %v1264_v8 }
  0x21   :  { %233 = vmatpush.bf16.msra.mxu1 %v1043_v35  ;;  %246 = vmatpush.bf16.msra.mxu2 %v1047_v36  ;;  %v1272_v12 = vld [vmem:[%s2599_s0 + $0x198] sm:$0xf0]  ;;  %v1271_v15 = vor.u32 %v1695_v10, %v1270_v9  ;;  %v1246_v16 = vld [vmem:[%s2599_s0 + $0x160] sm:$0xf]  ;;  %v1690_v17 = vld [vmem:[%s2599_s0 + $0x16c] sm:$0xf0] }
  0x22   :  { %259 = vmatpush.bf16.msra.mxu3 %v1051_v39  ;;  %v1688_v18 = vld [vmem:[%s2599_s0 + $0x164] sm:$0xf]  ;;  %v1275_v19 = vor.u32 %v1693_v11, %v1272_v12  ;;  %v1248_v20 = vld [vmem:[%s2599_s0 + $0x170] sm:$0xf0]  ;;  %v1254_v21 = vld [vmem:[%s2599_s0 + $0x168] sm:$0xf]  ;;  %v1247_v25 = vor.u32 %v1690_v17, %v1246_v16 }
  0x23   :  { %221 = vmatmul.bf16.vlgmr.msra.gmra.mxu0 %v2038_v52  ;;  %v1691_v22 = vld [vmem:[%s2599_s0 + $0x174] sm:$0xf0]  ;;  %v1689_v23 = vld [vmem:[%s2599_s0 + $0x16c] sm:$0xf]  ;;  %v1256_v24 = vld [vmem:[%s2599_s0 + $0x178] sm:$0xf0]  ;;  %v1251_v26 = vor.u32 %v1688_v18, %v1248_v20 }
  0x24   :  { %462 = vmatpush.bf16.msrb.mxu0 %v1311_v40  ;;  %247 = vmatmul.bf16.vlgmr.msra.gmra.mxu2 %v2038_v52  ;;  %v1255_v27 = vor.u32 %v1691_v22, %v1254_v21  ;;  %v1230_v28 = vld [vmem:[%s2599_s0 + $0x140] sm:$0xf]  ;;  %v1686_v29 = vld [vmem:[%s2599_s0 + $0x14c] sm:$0xf0]  ;;  %v1684_v30 = vld [vmem:[%s2599_s0 + $0x144] sm:$0xf]  ;;  %v1259_v31 = vor.u32 %v1689_v23, %v1256_v24 }
  0x25   :  { %475 = vmatpush.bf16.msrb.mxu1 %v1315_v41  ;;  %488 = vmatpush.bf16.msrb.mxu2 %v1319_v42  ;;  %v1232_v32 = vld [vmem:[%s2599_s0 + $0x150] sm:$0xf0]  ;;  %v1238_v33 = vld [vmem:[%s2599_s0 + $0x148] sm:$0xf]  ;;  %v1687_v34 = vld [vmem:[%s2599_s0 + $0x154] sm:$0xf0]  ;;  %v1231_v37 = vor.u32 %v1686_v29, %v1230_v28 }
  0x26   :  { %501 = vmatpush.bf16.msrb.mxu3 %v1323_v46  ;;  %234 = vmatmul.bf16.vlgmr.msra.gmra.mxu1 %v2038_v52  ;;  %v1685_v35 = vld [vmem:[%s2599_s0 + $0x14c] sm:$0xf]  ;;  %v1240_v36 = vld [vmem:[%s2599_s0 + $0x158] sm:$0xf0]  ;;  %v1235_v38 = vor.u32 %v1684_v30, %v1232_v32  ;;  %v1239_v39 = vor.u32 %v1687_v34, %v1238_v33  ;;  %v1214_v40 = vld [vmem:[%s2599_s0 + $0x120] sm:$0xf] }
  0x27   :  { %260 = vmatmul.bf16.vlgmr.msra.gmra.mxu3 %v2038_v52  ;;  %v1682_v41 = vld [vmem:[%s2599_s0 + $0x12c] sm:$0xf0]  ;;  %v1680_v42 = vld [vmem:[%s2599_s0 + $0x124] sm:$0xf]  ;;  %v1243_v43 = vor.u32 %v1685_v35, %v1240_v36  ;;  %v1216_v44 = vld [vmem:[%s2599_s0 + $0x130] sm:$0xf0] }
  0x28   :  { %463 = vmatpush.bf16.msrb.mxu0 %v1295_v53  ;;  %v1222_v45 = vld [vmem:[%s2599_s0 + $0x128] sm:$0xf]  ;;  %v1683_v46 = vld [vmem:[%s2599_s0 + $0x134] sm:$0xf0]  ;;  %v1681_v47 = vld [vmem:[%s2599_s0 + $0x12c] sm:$0xf]  ;;  %v1215_v49 = vor.u32 %v1682_v41, %v1214_v40 }
  0x29   :  { %476 = vmatpush.bf16.msrb.mxu1 %v1299_v54  ;;  %489 = vmatpush.bf16.msrb.mxu2 %v1303_v55  ;;  %v1224_v48 = vld [vmem:[%s2599_s0 + $0x138] sm:$0xf0]  ;;  %v1198_v50 = vld [vmem:[%s2599_s0 + $0x100] sm:$0xf]  ;;  %v1678_v51 = vld [vmem:[%s2599_s0 + $0x10c] sm:$0xf0]  ;;  %v1219_v54 = vor.u32 %v1680_v42, %v1216_v44  ;;  %v1223_v55 = vor.u32 %v1683_v46, %v1222_v45 }
  0x2a   :  { %502 = vmatpush.bf16.msrb.mxu3 %v1307_v59  ;;  %v15_v53 = vld [vmem:[%s2601_s2] sm:$0xff]  ;;  %v1200_v57 = vld [vmem:[%s2599_s0 + $0x110] sm:$0xf0]  ;;  %v1206_v58 = vld [vmem:[%s2599_s0 + $0x108] sm:$0xf]  ;;  %v1227_v59 = vor.u32 %v1681_v47, %v1224_v48  ;;  %v1774_v63 = vmov 0  }
  0x2b   :  { %v1676_v56 = vld [vmem:[%s2599_s0 + $0x104] sm:$0xf]  ;;  %v1679_v60 = vld [vmem:[%s2599_s0 + $0x114] sm:$0xf0]  ;;  %v1677_v61 = vld [vmem:[%s2599_s0 + $0x10c] sm:$0xf]  ;;  %1773 = vset.pattern.permute.xlu0 %v1774_v63 }
  0x2c   :  { %464 = vmatpush.bf16.msrb.mxu0 %v1279_v1  ;;  %v1208_v62 = vld [vmem:[%s2599_s0 + $0x118] sm:$0xf0]  ;;  %v1470_v0 = vld [vmem:[%s2599_s0 + $0x2e0] sm:$0xf]  ;;  %v1738_v1 = vld [vmem:[%s2599_s0 + $0x2ec] sm:$0xf0]  ;;  %50 = vperm.xlu0 %1773, %v15_v53   ;;  %v1207_v8 = vor.u32 %v1679_v60, %v1206_v58 }
  0x2d   :  { %477 = vmatpush.bf16.msrb.mxu1 %v1283_v2  ;;  %490 = vmatpush.bf16.msrb.mxu2 %v1287_v3  ;;  %v1736_v2 = vld [vmem:[%s2599_s0 + $0x2e4] sm:$0xf]  ;;  %v1199_v3 = vor.u32 %v1678_v51, %v1198_v50  ;;  %v1472_v4 = vld [vmem:[%s2599_s0 + $0x2f0] sm:$0xf0]  ;;  %v1478_v5 = vld [vmem:[%s2599_s0 + $0x2e8] sm:$0xf]  ;;  %v1211_v11 = vor.u32 %v1677_v61, %v1208_v62  ;;  %v1471_v12 = vor.u32 %v1738_v1, %v1470_v0 }
  0x2e   :  { %503 = vmatpush.bf16.msrb.mxu3 %v1291_v7  ;;  %v1739_v6 = vld [vmem:[%s2599_s0 + $0x2f4] sm:$0xf0]  ;;  %v1203_v7 = vor.u32 %v1676_v56, %v1200_v57  ;;  %v1737_v9 = vld [vmem:[%s2599_s0 + $0x2ec] sm:$0xf]  ;;  %v1480_v10 = vld [vmem:[%s2599_s0 + $0x2f8] sm:$0xf0] }
  0x2f   :  { %v1734_v16 = vld [vmem:[%s2599_s0 + $0x2cc] sm:$0xf0]  ;;  %v1732_v17 = vld [vmem:[%s2599_s0 + $0x2c4] sm:$0xf]  ;;  %v1483_v18 = vor.u32 %v1737_v9, %v1480_v10  ;;  %v1462_v20 = vld [vmem:[%s2599_s0 + $0x2c8] sm:$0xf] }
  0x30   :  { %465 = vmatpush.bf16.msrb.mxu0 %v1263_v13  ;;  %v1475_v13 = vor.u32 %v1736_v2, %v1472_v4  ;;  %v1735_v21 = vld [vmem:[%s2599_s0 + $0x2d4] sm:$0xf0]  ;;  %v1733_v22 = vld [vmem:[%s2599_s0 + $0x2cc] sm:$0xf]  ;;  %v1464_v23 = vld [vmem:[%s2599_s0 + $0x2d8] sm:$0xf0] }
  0x31   :  { %478 = vmatpush.bf16.msrb.mxu1 %v1267_v14  ;;  %491 = vmatpush.bf16.msrb.mxu2 %v1271_v15  ;;  %v1479_v14 = vor.u32 %v1739_v6, %v1478_v5  ;;  %v1454_v15 = vld [vmem:[%s2599_s0 + $0x2c0] sm:$0xf]  ;;  %v1730_v28 = vld [vmem:[%s2599_s0 + $0x2ac] sm:$0xf0]  ;;  %v1728_v29 = vld [vmem:[%s2599_s0 + $0x2a4] sm:$0xf]  ;;  %v1467_v30 = vor.u32 %v1733_v22, %v1464_v23 }
  0x32   :  { %504 = vmatpush.bf16.msrb.mxu3 %v1275_v19  ;;  %v1456_v19 = vld [vmem:[%s2599_s0 + $0x2d0] sm:$0xf0]  ;;  %v1455_v24 = vor.u32 %v1734_v16, %v1454_v15  ;;  %v1446_v32 = vld [vmem:[%s2599_s0 + $0x2a8] sm:$0xf]  ;;  %v1731_v33 = vld [vmem:[%s2599_s0 + $0x2b4] sm:$0xf0] }
  0x33   :  { %v1729_v34 = vld [vmem:[%s2599_s0 + $0x2ac] sm:$0xf]  ;;  %v1448_v35 = vld [vmem:[%s2599_s0 + $0x2b8] sm:$0xf0]  ;;  %v1726_v40 = vld [vmem:[%s2599_s0 + $0x28c] sm:$0xf0] }
  0x34   :  { %466 = vmatpush.bf16.msrb.mxu0 %v1247_v25  ;;  %v1459_v25 = vor.u32 %v1732_v17, %v1456_v19  ;;  %v1724_v41 = vld [vmem:[%s2599_s0 + $0x284] sm:$0xf]  ;;  %v1451_v42 = vor.u32 %v1729_v34, %v1448_v35  ;;  %v1430_v44 = vld [vmem:[%s2599_s0 + $0x288] sm:$0xf]  ;;  %v1727_v45 = vld [vmem:[%s2599_s0 + $0x294] sm:$0xf0] }
  0x35   :  { %479 = vmatpush.bf16.msrb.mxu1 %v1251_v26  ;;  %492 = vmatpush.bf16.msrb.mxu2 %v1255_v27  ;;  %v1463_v26 = vor.u32 %v1735_v21, %v1462_v20  ;;  %v1438_v27 = vld [vmem:[%s2599_s0 + $0x2a0] sm:$0xf]  ;;  %v1725_v46 = vld [vmem:[%s2599_s0 + $0x28c] sm:$0xf]  ;;  %v1432_v47 = vld [vmem:[%s2599_s0 + $0x298] sm:$0xf0]  ;;  %v1431_v50 = vor.u32 %v1727_v45, %v1430_v44 }
  0x36   :  { %505 = vmatpush.bf16.msrb.mxu3 %v1259_v31  ;;  %v1440_v31 = vld [vmem:[%s2599_s0 + $0x2b0] sm:$0xf0]  ;;  %v1439_v36 = vor.u32 %v1730_v28, %v1438_v27  ;;  %v1406_v51 = vld [vmem:[%s2599_s0 + $0x260] sm:$0xf]  ;;  %v1722_v53 = vld [vmem:[%s2599_s0 + $0x26c] sm:$0xf0] }
  0x37   :  { %v1408_v56 = vld [vmem:[%s2599_s0 + $0x270] sm:$0xf0]  ;;  %v1414_v57 = vld [vmem:[%s2599_s0 + $0x268] sm:$0xf]  ;;  %v1723_v58 = vld [vmem:[%s2599_s0 + $0x274] sm:$0xf0]  ;;  %v1407_v61 = vor.u32 %v1722_v53, %v1406_v51 }
  0x38   :  { %467 = vmatpush.bf16.msrb.mxu0 %v1231_v37  ;;  %v1443_v37 = vor.u32 %v1728_v29, %v1440_v31  ;;  %v1416_v60 = vld [vmem:[%s2599_s0 + $0x278] sm:$0xf0]  ;;  %v1415_v63 = vor.u32 %v1723_v58, %v1414_v57  ;;  %v1390_v0 = vld [vmem:[%s2599_s0 + $0x240] sm:$0xf]  ;;  %v1718_v1 = vld [vmem:[%s2599_s0 + $0x24c] sm:$0xf0] }
  0x39   :  { %480 = vmatpush.bf16.msrb.mxu1 %v1235_v38  ;;  %493 = vmatpush.bf16.msrb.mxu2 %v1239_v39  ;;  %v1447_v38 = vor.u32 %v1731_v33, %v1446_v32  ;;  %v1422_v39 = vld [vmem:[%s2599_s0 + $0x280] sm:$0xf]  ;;  %v1716_v2 = vld [vmem:[%s2599_s0 + $0x244] sm:$0xf]  ;;  %v1392_v4 = vld [vmem:[%s2599_s0 + $0x250] sm:$0xf0]  ;;  %v1391_v9 = vor.u32 %v1718_v1, %v1390_v0 }
  0x3a   :  { %506 = vmatpush.bf16.msrb.mxu3 %v1243_v43  ;;  %v1424_v43 = vld [vmem:[%s2599_s0 + $0x290] sm:$0xf0]  ;;  %v1423_v48 = vor.u32 %v1726_v40, %v1422_v39  ;;  %v1398_v5 = vld [vmem:[%s2599_s0 + $0x248] sm:$0xf]  ;;  %v1719_v6 = vld [vmem:[%s2599_s0 + $0x254] sm:$0xf0]  ;;  %v1395_v10 = vor.u32 %v1716_v2, %v1392_v4 }
  0x3b   :  { %v1376_v16 = vld [vmem:[%s2599_s0 + $0x230] sm:$0xf0]  ;;  %v1382_v17 = vld [vmem:[%s2599_s0 + $0x228] sm:$0xf]  ;;  %v1713_v19 = vld [vmem:[%s2599_s0 + $0x22c] sm:$0xf] }
  0x3c   :  { %468 = vmatpush.bf16.msrb.mxu0 %v1215_v49  ;;  %v1427_v49 = vor.u32 %v1724_v41, %v1424_v43  ;;  %v1384_v20 = vld [vmem:[%s2599_s0 + $0x238] sm:$0xf0]  ;;  %v1358_v22 = vld [vmem:[%s2599_s0 + $0x200] sm:$0xf]  ;;  %v1710_v23 = vld [vmem:[%s2599_s0 + $0x20c] sm:$0xf0] }
  0x3d   :  { %481 = vmatpush.bf16.msrb.mxu1 %v1219_v54  ;;  %494 = vmatpush.bf16.msrb.mxu2 %v1223_v55  ;;  %v1720_v54 = vld [vmem:[%s2599_s0 + $0x264] sm:$0xf]  ;;  %v1435_v55 = vor.u32 %v1725_v46, %v1432_v47  ;;  %v1360_v27 = vld [vmem:[%s2599_s0 + $0x210] sm:$0xf0]  ;;  %v1366_v28 = vld [vmem:[%s2599_s0 + $0x208] sm:$0xf]  ;;  %v1387_v29 = vor.u32 %v1713_v19, %v1384_v20 }
  0x3e   :  { %507 = vmatpush.bf16.msrb.mxu3 %v1227_v59  ;;  %v1721_v59 = vld [vmem:[%s2599_s0 + $0x26c] sm:$0xf]  ;;  %v1411_v62 = vor.u32 %v1720_v54, %v1408_v56  ;;  %v1368_v32 = vld [vmem:[%s2599_s0 + $0x218] sm:$0xf0]  ;;  %v1630_v33 = vld [vmem:[%s2599_s0 + $0x3e0] sm:$0xf] }
  0x3f   :  { %v1709_v31 = vld [vmem:[%s2599_s0 + $0x20c] sm:$0xf]  ;;  %v1770_v34 = vld [vmem:[%s2599_s0 + $0x3ec] sm:$0xf0]  ;;  %v1768_v35 = vld [vmem:[%s2599_s0 + $0x3e4] sm:$0xf] }
  0x40   :  { %469 = vmatpush.bf16.msrb.mxu0 %v1199_v3  ;;  %v1419_v3 = vor.u32 %v1721_v59, %v1416_v60  ;;  %v1771_v39 = vld [vmem:[%s2599_s0 + $0x3f4] sm:$0xf0]  ;;  %v1640_v43 = vld [vmem:[%s2599_s0 + $0x3f8] sm:$0xf0]  ;;  %v1371_v44 = vor.u32 %v1709_v31, %v1368_v32  ;;  %v1631_v45 = vor.u32 %v1770_v34, %v1630_v33  ;;  %v1616_v53 = vld [vmem:[%s2599_s0 + $0x3d0] sm:$0xf0] }
  0x41   :  { %482 = vmatpush.bf16.msrb.mxu1 %v1203_v7  ;;  %495 = vmatpush.bf16.msrb.mxu2 %v1207_v8  ;;  %v1717_v7 = vld [vmem:[%s2599_s0 + $0x24c] sm:$0xf]  ;;  %v1400_v8 = vld [vmem:[%s2599_s0 + $0x258] sm:$0xf0]  ;;  %v1622_v54 = vld [vmem:[%s2599_s0 + $0x3c8] sm:$0xf] }
  0x42   :  { %508 = vmatpush.bf16.msrb.mxu3 %v1211_v11  ;;  %v1399_v11 = vor.u32 %v1719_v6, %v1398_v5  ;;  %v1403_v15 = vor.u32 %v1717_v7, %v1400_v8  ;;  %v1765_v56 = vld [vmem:[%s2599_s0 + $0x3cc] sm:$0xf]  ;;  %v1624_v57 = vld [vmem:[%s2599_s0 + $0x3d8] sm:$0xf0]  ;;  %v1600_v1 = vld [vmem:[%s2599_s0 + $0x3b0] sm:$0xf0] }
  0x43   :  { %470 = vmatmul.bf16.vlgmr.msrb.gmra.mxu0 %v2038_v52  ;;  %v1627_v0 = vor.u32 %v1765_v56, %v1624_v57  ;;  %v1606_v2 = vld [vmem:[%s2599_s0 + $0x3a8] sm:$0xf]  ;;  %v1761_v4 = vld [vmem:[%s2599_s0 + $0x3ac] sm:$0xf]  ;;  %v1608_v5 = vld [vmem:[%s2599_s0 + $0x3b8] sm:$0xf0] }
  0x44   :  { %715 = vmatpush.bf16.msra.mxu0 %v1471_v12  ;;  %496 = vmatmul.bf16.vlgmr.msrb.gmra.mxu2 %v2038_v52  ;;  %v1374_v12 = vld [vmem:[%s2599_s0 + $0x220] sm:$0xf]  ;;  %v1750_v34 = vld [vmem:[%s2599_s0 + $0x34c] sm:$0xf0] }
  0x45   :  { %728 = vmatpush.bf16.msra.mxu1 %v1475_v13  ;;  %741 = vmatpush.bf16.msra.mxu2 %v1479_v14  ;;  %v1714_v13 = vld [vmem:[%s2599_s0 + $0x22c] sm:$0xf0]  ;;  %v1712_v14 = vld [vmem:[%s2599_s0 + $0x224] sm:$0xf]  ;;  %v1550_v33 = vld [vmem:[%s2599_s0 + $0x340] sm:$0xf] }
  0x46   :  { %754 = vmatpush.bf16.msra.mxu3 %v1483_v18  ;;  %483 = vmatmul.bf16.vlgmr.msrb.gmra.mxu1 %v2038_v52  ;;  %v1715_v18 = vld [vmem:[%s2599_s0 + $0x234] sm:$0xf0]  ;;  %v1375_v21 = vor.u32 %v1714_v13, %v1374_v12  ;;  %v1611_v12 = vor.u32 %v1761_v4, %v1608_v5  ;;  %v1584_v13 = vld [vmem:[%s2599_s0 + $0x390] sm:$0xf0] }
  0x47   :  { %509 = vmatmul.bf16.vlgmr.msrb.gmra.mxu3 %v2038_v52 }
  0x48   :  { %716 = vmatpush.bf16.msra.mxu0 %v1455_v24  ;;  %v1379_v24 = vor.u32 %v1712_v14, %v1376_v16  ;;  %v1590_v14 = vld [vmem:[%s2599_s0 + $0x388] sm:$0xf]  ;;  %v1757_v16 = vld [vmem:[%s2599_s0 + $0x38c] sm:$0xf] }
  0x49   :  { %729 = vmatpush.bf16.msra.mxu1 %v1459_v25  ;;  %742 = vmatpush.bf16.msra.mxu2 %v1463_v26  ;;  %v1383_v25 = vor.u32 %v1715_v18, %v1382_v17  ;;  %v1708_v26 = vld [vmem:[%s2599_s0 + $0x204] sm:$0xf]  ;;  %v1592_v17 = vld [vmem:[%s2599_s0 + $0x398] sm:$0xf0] }
  0x4a   :  { %755 = vmatpush.bf16.msra.mxu3 %v1467_v30  ;;  %v1711_v30 = vld [vmem:[%s2599_s0 + $0x214] sm:$0xf0]  ;;  %v1363_v40 = vor.u32 %v1708_v26, %v1360_v27  ;;  %v1574_v26 = vld [vmem:[%s2599_s0 + $0x368] sm:$0xf] }
  0x4b   :  { %v1367_v41 = vor.u32 %v1711_v30, %v1366_v28  ;;  %v1755_v27 = vld [vmem:[%s2599_s0 + $0x374] sm:$0xf0]  ;;  %v1753_v28 = vld [vmem:[%s2599_s0 + $0x36c] sm:$0xf] }
  0x4c   :  { %717 = vmatpush.bf16.msra.mxu0 %v1439_v36  ;;  %v1359_v36 = vor.u32 %v1710_v23, %v1358_v22  ;;  %v1754_v22 = vld [vmem:[%s2599_s0 + $0x36c] sm:$0xf0]  ;;  %v1752_v23 = vld [vmem:[%s2599_s0 + $0x364] sm:$0xf]  ;;  %v1575_v32 = vor.u32 %v1755_v27, %v1574_v26 }
  0x4d   :  { %730 = vmatpush.bf16.msra.mxu1 %v1443_v37  ;;  %743 = vmatpush.bf16.msra.mxu2 %v1447_v38  ;;  %v1632_v37 = vld [vmem:[%s2599_s0 + $0x3f0] sm:$0xf0]  ;;  %v1638_v38 = vld [vmem:[%s2599_s0 + $0x3e8] sm:$0xf] }
  0x4e   :  { %756 = vmatpush.bf16.msra.mxu3 %v1451_v42  ;;  %v1769_v42 = vld [vmem:[%s2599_s0 + $0x3ec] sm:$0xf]  ;;  %v1635_v46 = vor.u32 %v1768_v35, %v1632_v37  ;;  %v1639_v47 = vor.u32 %v1771_v39, %v1638_v38  ;;  %v1748_v35 = vld [vmem:[%s2599_s0 + $0x344] sm:$0xf]  ;;  %v1552_v37 = vld [vmem:[%s2599_s0 + $0x350] sm:$0xf0] }
  0x4f   :  { %v1643_v51 = vor.u32 %v1769_v42, %v1640_v43  ;;  %v1558_v38 = vld [vmem:[%s2599_s0 + $0x348] sm:$0xf]  ;;  %v1751_v39 = vld [vmem:[%s2599_s0 + $0x354] sm:$0xf0]  ;;  %v1551_v42 = vor.u32 %v1750_v34, %v1550_v33  ;;  %v1555_v43 = vor.u32 %v1748_v35, %v1552_v37 }
  0x50   :  { %718 = vmatpush.bf16.msra.mxu0 %v1423_v48  ;;  %v1614_v48 = vld [vmem:[%s2599_s0 + $0x3c0] sm:$0xf] }
  0x51   :  { %731 = vmatpush.bf16.msra.mxu1 %v1427_v49  ;;  %744 = vmatpush.bf16.msra.mxu2 %v1431_v50  ;;  %v1766_v49 = vld [vmem:[%s2599_s0 + $0x3cc] sm:$0xf0]  ;;  %v1764_v50 = vld [vmem:[%s2599_s0 + $0x3c4] sm:$0xf] }
  0x52   :  { %757 = vmatpush.bf16.msra.mxu3 %v1435_v55  ;;  %v1767_v55 = vld [vmem:[%s2599_s0 + $0x3d4] sm:$0xf0]  ;;  %v1615_v58 = vor.u32 %v1766_v49, %v1614_v48  ;;  %v1619_v59 = vor.u32 %v1764_v50, %v1616_v53  ;;  %v1536_v49 = vld [vmem:[%s2599_s0 + $0x330] sm:$0xf0]  ;;  %v1542_v50 = vld [vmem:[%s2599_s0 + $0x328] sm:$0xf] }
  0x53   :  { %v1623_v60 = vor.u32 %v1767_v55, %v1622_v54  ;;  %v1745_v53 = vld [vmem:[%s2599_s0 + $0x32c] sm:$0xf]  ;;  %v1544_v54 = vld [vmem:[%s2599_s0 + $0x338] sm:$0xf0] }
  0x54   :  { %719 = vmatpush.bf16.msra.mxu0 %v1407_v61  ;;  %v1598_v61 = vld [vmem:[%s2599_s0 + $0x3a0] sm:$0xf] }
  0x55   :  { %732 = vmatpush.bf16.msra.mxu1 %v1411_v62  ;;  %745 = vmatpush.bf16.msra.mxu2 %v1415_v63  ;;  %v1762_v62 = vld [vmem:[%s2599_s0 + $0x3ac] sm:$0xf0]  ;;  %v1760_v63 = vld [vmem:[%s2599_s0 + $0x3a4] sm:$0xf] }
  0x56   :  { %758 = vmatpush.bf16.msra.mxu3 %v1419_v3  ;;  %v1763_v3 = vld [vmem:[%s2599_s0 + $0x3b4] sm:$0xf0]  ;;  %v1599_v6 = vor.u32 %v1762_v62, %v1598_v61  ;;  %v1603_v7 = vor.u32 %v1760_v63, %v1600_v1  ;;  %v1547_v61 = vor.u32 %v1745_v53, %v1544_v54  ;;  %v1520_v62 = vld [vmem:[%s2599_s0 + $0x310] sm:$0xf0]  ;;  %v1526_v63 = vld [vmem:[%s2599_s0 + $0x308] sm:$0xf] }
  0x57   :  { %v1607_v8 = vor.u32 %v1763_v3, %v1606_v2  ;;  %v1741_v1 = vld [vmem:[%s2599_s0 + $0x30c] sm:$0xf]  ;;  %v1528_v2 = vld [vmem:[%s2599_s0 + $0x318] sm:$0xf0] }
  0x58   :  { %720 = vmatpush.bf16.msra.mxu0 %v1391_v9  ;;  %v1582_v9 = vld [vmem:[%s2599_s0 + $0x380] sm:$0xf] }
  0x59   :  { %733 = vmatpush.bf16.msra.mxu1 %v1395_v10  ;;  %746 = vmatpush.bf16.msra.mxu2 %v1399_v11  ;;  %v1758_v10 = vld [vmem:[%s2599_s0 + $0x38c] sm:$0xf0]  ;;  %v1756_v11 = vld [vmem:[%s2599_s0 + $0x384] sm:$0xf] }
  0x5a   :  { %759 = vmatpush.bf16.msra.mxu3 %v1403_v15  ;;  %v1759_v15 = vld [vmem:[%s2599_s0 + $0x394] sm:$0xf0]  ;;  %v1583_v18 = vor.u32 %v1758_v10, %v1582_v9  ;;  %v1587_v19 = vor.u32 %v1756_v11, %v1584_v13 }
  0x5b   :  { %v1591_v20 = vor.u32 %v1759_v15, %v1590_v14 }
  0x5c   :  { %721 = vmatpush.bf16.msra.mxu0 %v1375_v21  ;;  %v1566_v21 = vld [vmem:[%s2599_s0 + $0x360] sm:$0xf] }
  0x5d   :  { %734 = vmatpush.bf16.msra.mxu1 %v1379_v24  ;;  %747 = vmatpush.bf16.msra.mxu2 %v1383_v25  ;;  %v1595_v24 = vor.u32 %v1757_v16, %v1592_v17  ;;  %v1568_v25 = vld [vmem:[%s2599_s0 + $0x370] sm:$0xf0]  ;;  %v1567_v30 = vor.u32 %v1754_v22, %v1566_v21 }
  0x5e   :  { %760 = vmatpush.bf16.msra.mxu3 %v1387_v29  ;;  %v1576_v29 = vld [vmem:[%s2599_s0 + $0x378] sm:$0xf0]  ;;  %v1571_v31 = vor.u32 %v1752_v23, %v1568_v25 }
  0x60   :  { %722 = vmatpush.bf16.msra.mxu0 %v1359_v36  ;;  %v1579_v36 = vor.u32 %v1753_v28, %v1576_v29 }
  0x61   :  { %735 = vmatpush.bf16.msra.mxu1 %v1363_v40  ;;  %748 = vmatpush.bf16.msra.mxu2 %v1367_v41  ;;  %v1749_v40 = vld [vmem:[%s2599_s0 + $0x34c] sm:$0xf]  ;;  %v1560_v41 = vld [vmem:[%s2599_s0 + $0x358] sm:$0xf0] }
  0x62   :  { %761 = vmatpush.bf16.msra.mxu3 %v1371_v44  ;;  %v1559_v44 = vor.u32 %v1751_v39, %v1558_v38  ;;  %v1563_v48 = vor.u32 %v1749_v40, %v1560_v41 }
  0x63   :  { %723 = vmatmul.bf16.vlgmr.msra.gmra.mxu0 %v2038_v52 }
  0x64   :  { %968 = vmatpush.bf16.msrb.mxu0 %v1631_v45  ;;  %736 = vmatmul.bf16.vlgmr.msra.gmra.mxu1 %v2038_v52  ;;  %v1534_v45 = vld [vmem:[%s2599_s0 + $0x320] sm:$0xf] }
  0x65   :  { %981 = vmatpush.bf16.msrb.mxu1 %v1635_v46  ;;  %994 = vmatpush.bf16.msrb.mxu2 %v1639_v47  ;;  %v1746_v46 = vld [vmem:[%s2599_s0 + $0x32c] sm:$0xf0]  ;;  %v1744_v47 = vld [vmem:[%s2599_s0 + $0x324] sm:$0xf] }
  0x66   :  { %1007 = vmatpush.bf16.msrb.mxu3 %v1643_v51  ;;  %749 = vmatmul.bf16.vlgmr.msra.gmra.mxu2 %v2038_v52  ;;  %v1747_v51 = vld [vmem:[%s2599_s0 + $0x334] sm:$0xf0]  ;;  %v1535_v55 = vor.u32 %v1746_v46, %v1534_v45  ;;  %v1539_v56 = vor.u32 %v1744_v47, %v1536_v49 }
  0x67   :  { %762 = vmatmul.bf16.vlgmr.msra.gmra.mxu3 %v2038_v52  ;;  %v1543_v57 = vor.u32 %v1747_v51, %v1542_v50 }
  0x68   :  { %969 = vmatpush.bf16.msrb.mxu0 %v1615_v58  ;;  %v1518_v58 = vld [vmem:[%s2599_s0 + $0x300] sm:$0xf] }
  0x69   :  { %982 = vmatpush.bf16.msrb.mxu1 %v1619_v59  ;;  %995 = vmatpush.bf16.msrb.mxu2 %v1623_v60  ;;  %v1742_v59 = vld [vmem:[%s2599_s0 + $0x30c] sm:$0xf0]  ;;  %v1740_v60 = vld [vmem:[%s2599_s0 + $0x304] sm:$0xf] }
  0x6a   :  { %1008 = vmatpush.bf16.msrb.mxu3 %v1627_v0  ;;  %v1743_v0 = vld [vmem:[%s2599_s0 + $0x314] sm:$0xf0]  ;;  %v1519_v3 = vor.u32 %v1742_v59, %v1518_v58  ;;  %v1523_v4 = vor.u32 %v1740_v60, %v1520_v62 }
  0x6b   :  { %v1527_v5 = vor.u32 %v1743_v0, %v1526_v63 }
  0x6c   :  { %970 = vmatpush.bf16.msrb.mxu0 %v1599_v6  ;;  %v1531_v6 = vor.u32 %v1741_v1, %v1528_v2 }
  0x6d   :  { %983 = vmatpush.bf16.msrb.mxu1 %v1603_v7  ;;  %996 = vmatpush.bf16.msrb.mxu2 %v1607_v8 }
  0x6e   :  { %1009 = vmatpush.bf16.msrb.mxu3 %v1611_v12 }
  0x70   :  { %971 = vmatpush.bf16.msrb.mxu0 %v1583_v18 }
  0x71   :  { %984 = vmatpush.bf16.msrb.mxu1 %v1587_v19  ;;  %997 = vmatpush.bf16.msrb.mxu2 %v1591_v20 }
  0x72   :  { %1010 = vmatpush.bf16.msrb.mxu3 %v1595_v24 }
  0x74   :  { %972 = vmatpush.bf16.msrb.mxu0 %v1567_v30 }
  0x75   :  { %985 = vmatpush.bf16.msrb.mxu1 %v1571_v31  ;;  %998 = vmatpush.bf16.msrb.mxu2 %v1575_v32 }
  0x76   :  { %1011 = vmatpush.bf16.msrb.mxu3 %v1579_v36 }
  0x78   :  { %973 = vmatpush.bf16.msrb.mxu0 %v1551_v42 }
  0x79   :  { %986 = vmatpush.bf16.msrb.mxu1 %v1555_v43  ;;  %999 = vmatpush.bf16.msrb.mxu2 %v1559_v44 }
  0x7a   :  { %1012 = vmatpush.bf16.msrb.mxu3 %v1563_v48 }
  0x7c   :  { %974 = vmatpush.bf16.msrb.mxu0 %v1535_v55 }
  0x7d   :  { %987 = vmatpush.bf16.msrb.mxu1 %v1539_v56  ;;  %1000 = vmatpush.bf16.msrb.mxu2 %v1543_v57 }
  0x7e   :  { %1013 = vmatpush.bf16.msrb.mxu3 %v1547_v61 }
  0x80   :  { %975 = vmatpush.bf16.msrb.mxu0 %v1519_v3 }
  0x81   :  { %988 = vmatpush.bf16.msrb.mxu1 %v1523_v4  ;;  %1001 = vmatpush.bf16.msrb.mxu2 %v1527_v5 }
  0x82   :  { %1014 = vmatpush.bf16.msrb.mxu3 %v1531_v6 }
  0x83   :  { %976 = vmatmul.bf16.vlgmr.msrb.gmra.mxu0 %v2038_v52 }
  0x84   :  { %989 = vmatmul.bf16.vlgmr.msrb.gmra.mxu1 %v2038_v52  ;;  %1002 = vmatmul.bf16.vlgmr.msrb.gmra.mxu2 %v2038_v52 }
  0x85   :  { %1015 = vmatmul.bf16.vlgmr.msrb.gmra.mxu3 %v2038_v52 }
  0x9e   :  { %v51_v30 = vpop.permute.xlu0 %50 }
  0xa0   :  { %v222_v7 = vpop.f32.mrf.mxu0 }
  0xa1   :  { %v223_v31 = vadd.f32 %v222_v7, %v51_v30 }
  0xa3   :  { %v235_v8 = vpop.f32.mrf.mxu1  ;;  %v265_v37 = vmax.f32 %v223_v31, 0.0 }
  0xa4   :  { %v236_v33 = vadd.f32 %v235_v8, %v51_v30 }
  0xa6   :  { %v266_v39 = vmax.f32 %v236_v33, 0.0 }
  0xa7   :  { %v248_v9 = vpop.f32.mrf.mxu2 }
  0xa8   :  { %v224_v11 = vpop.f32.mrf.mxu0  ;;  %v249_v50 = vadd.f32 %v248_v9, %v51_v30 }
  0xaa   :  { %v261_v10 = vpop.f32.mrf.mxu3  ;;  %v267_v63 = vmax.f32 %v249_v50, 0.0 }
  0xab   :  { %v237_v12 = vpop.f32.mrf.mxu1  ;;  %v262_v54 = vadd.f32 %v261_v10, %v51_v30 }
  0xad   :  { %v268_v2 = vmax.f32 %v262_v54, 0.0 }
  0xaf   :  { %v250_v13 = vpop.f32.mrf.mxu2 }
  0xb2   :  { %v263_v14 = vpop.f32.mrf.mxu3 }
  0xc0   :  { %v471_v15 = vpop.f32.mrf.mxu0 }
  0xc1   :  { %v472_v32 = vadd.f32 %v471_v15, %v51_v30 }
  0xc3   :  { %v484_v16 = vpop.f32.mrf.mxu1  ;;  %v514_v38 = vmax.f32 %v472_v32, 0.0 }
  0xc4   :  { %v485_v34 = vadd.f32 %v484_v16, %v51_v30 }
  0xc5   :  { %v518_v45 = vmax.f32 %v265_v37, %v514_v38 }
  0xc6   :  { %v515_v40 = vmax.f32 %v485_v34, 0.0 }
  0xc7   :  { %v497_v17 = vpop.f32.mrf.mxu2 }
  0xc8   :  { %v473_v19 = vpop.f32.mrf.mxu0  ;;  %v498_v42 = vadd.f32 %v497_v17, %v51_v30  ;;  %v519_v49 = vmax.f32 %v266_v39, %v515_v40 }
  0xca   :  { %v510_v18 = vpop.f32.mrf.mxu3  ;;  %v516_v58 = vmax.f32 %v498_v42, 0.0 }
  0xcb   :  { %v486_v20 = vpop.f32.mrf.mxu1  ;;  %v511_v46 = vadd.f32 %v510_v18, %v51_v30 }
  0xcc   :  { %v520_v5 = vmax.f32 %v267_v63, %v516_v58 }
  0xcd   :  { %v517_v61 = vmax.f32 %v511_v46, 0.0 }
  0xcf   :  { %v499_v21 = vpop.f32.mrf.mxu2  ;;  %v521_v9 = vmax.f32 %v268_v2, %v517_v61 }
  0xd2   :  { %v512_v22 = vpop.f32.mrf.mxu3 }
  0xe0   :  { %v724_v23 = vpop.f32.mrf.mxu0 }
  0xe1   :  { %v737_v24 = vpop.f32.mrf.mxu1  ;;  %v725_v35 = vadd.f32 %v724_v23, %v51_v30 }
  0xe2   :  { %v738_v36 = vadd.f32 %v737_v24, %v51_v30 }
  0xe3   :  { %v767_v41 = vmax.f32 %v725_v35, 0.0 }
  0xe4   :  { %v768_v43 = vmax.f32 %v738_v36, 0.0 }
  0xe5   :  { %v771_v55 = vmax.f32 %v518_v45, %v767_v41 }
  0xe6   :  { %v772_v59 = vmax.f32 %v519_v49, %v768_v43 }
  0xe8   :  { %v726_v26 = vpop.f32.mrf.mxu0 }
  0xe9   :  { %v750_v25 = vpop.f32.mrf.mxu2  ;;  %v739_v27 = vpop.f32.mrf.mxu1 }
  0xea   :  { %v763_v52 = vpop.f32.mrf.mxu3  ;;  %v751_v51 = vadd.f32 %v750_v25, %v51_v30 }
  0xeb   :  { %v764_v56 = vadd.f32 %v763_v52, %v51_v30 }
  0xec   :  { %v769_v0 = vmax.f32 %v751_v51, 0.0 }
  0xed   :  { %v770_v3 = vmax.f32 %v764_v56, 0.0 }
  0xee   :  { %v773_v12 = vmax.f32 %v520_v5, %v769_v0 }
  0xef   :  { %v774_v14 = vmax.f32 %v521_v9, %v770_v3 }
  0xf1   :  { %v752_v28 = vpop.f32.mrf.mxu2 }
  0xf2   :  { %v765_v29 = vpop.f32.mrf.mxu3 }
 0x100   :  { %v977_v44 = vpop.f32.mrf.mxu0 }
 0x101   :  { %v978_v47 = vadd.f32 %v977_v44, %v51_v30  ;;  %v990_v48 = vpop.f32.mrf.mxu1 }
 0x102   :  { %v991_v53 = vadd.f32 %v990_v48, %v51_v30 }
 0x103   :  { %v1020_v57 = vmax.f32 %v978_v47, 0.0 }
 0x104   :  { %v1021_v60 = vmax.f32 %v991_v53, 0.0 }
 0x105   :  { %v1024_v62 = vmax.f32 %v771_v55, %v1020_v57 }
 0x106   :  { %v1025_v1 = vmax.f32 %v772_v59, %v1021_v60 }
 0x107   :  { %1028 = vst [vmem:[%s2602_s3] sm:$0xff] %v1024_v62  ;;  %v1003_v4 = vpop.f32.mrf.mxu2 }
 0x108   :  { %1029 = vst [vmem:[%s2602_s3 + $0x8] sm:$0xff] %v1025_v1  ;;  %v1004_v6 = vadd.f32 %v1003_v4, %v51_v30  ;;  %v1016_v7 = vpop.f32.mrf.mxu3  ;;  %v979_v8 = vpop.f32.mrf.mxu0 }
 0x109   :  { %v1017_v10 = vadd.f32 %v1016_v7, %v51_v30  ;;  %v992_v11 = vpop.f32.mrf.mxu1 }
 0x10a   :  { %v1022_v13 = vmax.f32 %v1004_v6, 0.0 }
 0x10b   :  { %v1023_v15 = vmax.f32 %v1017_v10, 0.0 }
 0x10c   :  { %v1026_v16 = vmax.f32 %v773_v12, %v1022_v13 }
 0x10d   :  { %v1027_v17 = vmax.f32 %v774_v14, %v1023_v15 }
 0x10e   :  { %1030 = vst [vmem:[%s2602_s3 + $0x10] sm:$0xff] %v1026_v16 }
 0x10f   :  { %1031 = vst [vmem:[%s2602_s3 + $0x18] sm:$0xff] %v1027_v17  ;;  %v1005_v18 = vpop.f32.mrf.mxu2 }
 0x110   :  { %v1018_v19 = vpop.f32.mrf.mxu3 }

// kernel: convnet_simple_forward.4
= control target key start
LH: loop header
LB: loop body
LE: loop exit
PB: predicated region body
PF: predicated region fallthrough
CT: control target
= control target key end

     0   :  { %v1113_v29 = vmov 0   ;;  %s1362_s0 = inlined_call_operand.vmem [shape: bf16[4,256,128], index: 0, kind: input, shape index: {}]   ;;  %s1363_s2 = inlined_call_operand.vmem [shape: f32[16,1], index: 2, kind: input, shape index: {}]   ;;  %s1364_s1 = inlined_call_operand.vmem [shape: bf16[16,256], index: 1, kind: input, shape index: {}]   ;;  %s1365_s3 = inlined_call_operand.vmem [shape: f32[16,128], index: 3, kind: output, shape index: {}]  }
   0x1   :  { %v1054_v0 = vld [vmem:[%s1362_s0 + $0x38] sm:$0xff]  ;;  %v1053_v4 = vld [vmem:[%s1362_s0 + $0x30] sm:$0xff]  ;;  %v1052_v8 = vld [vmem:[%s1362_s0 + $0x28] sm:$0xff]  ;;  %1112 = vset.pattern.permute.xlu0 %v1113_v29 }
   0x2   :  { %v1062_v1 = vld [vmem:[%s1362_s0 + $0x78] sm:$0xff]  ;;  %166 = vmatpush.bf16.msra.mxu0 %v1054_v0  ;;  %v1061_v5 = vld [vmem:[%s1362_s0 + $0x70] sm:$0xff]  ;;  %v1060_v9 = vld [vmem:[%s1362_s0 + $0x68] sm:$0xff] }
   0x3   :  { %v1070_v2 = vld [vmem:[%s1362_s0 + $0xb8] sm:$0xff]  ;;  %180 = vmatpush.bf16.msra.mxu1 %v1062_v1  ;;  %v1069_v6 = vld [vmem:[%s1362_s0 + $0xb0] sm:$0xff]  ;;  %v1068_v10 = vld [vmem:[%s1362_s0 + $0xa8] sm:$0xff] }
   0x4   :  { %v1078_v3 = vld [vmem:[%s1362_s0 + $0xf8] sm:$0xff]  ;;  %325 = vmatpush.bf16.msra.mxu2 %v1070_v2  ;;  %v1077_v7 = vld [vmem:[%s1362_s0 + $0xf0] sm:$0xff]  ;;  %v1076_v11 = vld [vmem:[%s1362_s0 + $0xe8] sm:$0xff] }
   0x5   :  { %339 = vmatpush.bf16.msra.mxu3 %v1078_v3  ;;  %v1051_v12 = vld [vmem:[%s1362_s0 + $0x20] sm:$0xff]  ;;  %v1050_v16 = vld [vmem:[%s1362_s0 + $0x18] sm:$0xff]  ;;  %v1049_v20 = vld [vmem:[%s1362_s0 + $0x10] sm:$0xff] }
   0x6   :  { %167 = vmatpush.bf16.msra.mxu0 %v1053_v4  ;;  %v1059_v13 = vld [vmem:[%s1362_s0 + $0x60] sm:$0xff]  ;;  %v1058_v17 = vld [vmem:[%s1362_s0 + $0x58] sm:$0xff]  ;;  %v1057_v21 = vld [vmem:[%s1362_s0 + $0x50] sm:$0xff] }
   0x7   :  { %181 = vmatpush.bf16.msra.mxu1 %v1061_v5  ;;  %v1067_v14 = vld [vmem:[%s1362_s0 + $0xa0] sm:$0xff]  ;;  %v1066_v18 = vld [vmem:[%s1362_s0 + $0x98] sm:$0xff]  ;;  %v1065_v22 = vld [vmem:[%s1362_s0 + $0x90] sm:$0xff] }
   0x8   :  { %326 = vmatpush.bf16.msra.mxu2 %v1069_v6  ;;  %v1075_v15 = vld [vmem:[%s1362_s0 + $0xe0] sm:$0xff]  ;;  %v1074_v19 = vld [vmem:[%s1362_s0 + $0xd8] sm:$0xff]  ;;  %v1073_v23 = vld [vmem:[%s1362_s0 + $0xd0] sm:$0xff] }
   0x9   :  { %340 = vmatpush.bf16.msra.mxu3 %v1077_v7  ;;  %v1048_v24 = vld [vmem:[%s1362_s0 + $0x8] sm:$0xff]  ;;  %v16_v26 = vld [vmem:[%s1363_s2] sm:$0xff]  ;;  %v1086_v38 = vld [vmem:[%s1362_s0 + $0x138] sm:$0xff] }
   0xa   :  { %168 = vmatpush.bf16.msra.mxu0 %v1052_v8  ;;  %v1056_v25 = vld [vmem:[%s1362_s0 + $0x48] sm:$0xff]  ;;  %v1047_v30 = vld [vmem:[%s1362_s0] sm:$0xff]  ;;  %52 = vperm.xlu0 %1112, %v16_v26   ;;  %v1094_v39 = vld [vmem:[%s1362_s0 + $0x178] sm:$0xff] }
   0xb   :  { %182 = vmatpush.bf16.msra.mxu1 %v1060_v9  ;;  %v1064_v27 = vld [vmem:[%s1362_s0 + $0x88] sm:$0xff]  ;;  %v1055_v31 = vld [vmem:[%s1362_s0 + $0x40] sm:$0xff]  ;;  %v1102_v40 = vld [vmem:[%s1362_s0 + $0x1b8] sm:$0xff] }
   0xc   :  { %327 = vmatpush.bf16.msra.mxu2 %v1068_v10  ;;  %v1072_v28 = vld [vmem:[%s1362_s0 + $0xc8] sm:$0xff]  ;;  %v1063_v32 = vld [vmem:[%s1362_s0 + $0x80] sm:$0xff]  ;;  %v1110_v41 = vld [vmem:[%s1362_s0 + $0x1f8] sm:$0xff] }
   0xd   :  { %341 = vmatpush.bf16.msra.mxu3 %v1076_v11  ;;  %v1071_v33 = vld [vmem:[%s1362_s0 + $0xc0] sm:$0xff]  ;;  %v1046_v35 = vld [vmem:[%s1364_s1 + $0x4] sm:$0xf0]  ;;  %v689_v37 = vld [vmem:[%s1364_s1 + $0x8] sm:$0xf0] }
   0xe   :  { %169 = vmatpush.bf16.msra.mxu0 %v1051_v12  ;;  %v687_v34 = vld [vmem:[%s1364_s1] sm:$0xf]  ;;  %v1045_v36 = vld [vmem:[%s1364_s1 + $0x4] sm:$0xf]  ;;  %v1085_v44 = vld [vmem:[%s1362_s0 + $0x130] sm:$0xff] }
   0xf   :  { %183 = vmatpush.bf16.msra.mxu1 %v1059_v13  ;;  %v1257_v42 = vor.u32 %v1046_v35, %v687_v34  ;;  %v1259_v43 = vor.u32 %v1045_v36, %v689_v37  ;;  %v1093_v45 = vld [vmem:[%s1362_s0 + $0x170] sm:$0xff]  ;;  %v17_v48 = vld [vmem:[%s1363_s2 + $0x8] sm:$0xff]  ;;  %v1083_v53 = vld [vmem:[%s1362_s0 + $0x120] sm:$0xff] }
  0x10   :  { %328 = vmatpush.bf16.msra.mxu2 %v1067_v14  ;;  %v1101_v46 = vld [vmem:[%s1362_s0 + $0x1b0] sm:$0xff]  ;;  %v1084_v49 = vld [vmem:[%s1362_s0 + $0x128] sm:$0xff]  ;;  %v1091_v54 = vld [vmem:[%s1362_s0 + $0x160] sm:$0xff] }
  0x11   :  { %342 = vmatpush.bf16.msra.mxu3 %v1075_v15  ;;  %v1109_v47 = vld [vmem:[%s1362_s0 + $0x1f0] sm:$0xff]  ;;  %v1092_v50 = vld [vmem:[%s1362_s0 + $0x168] sm:$0xff]  ;;  %v1099_v55 = vld [vmem:[%s1362_s0 + $0x1a0] sm:$0xff] }
  0x12   :  { %170 = vmatpush.bf16.msra.mxu0 %v1050_v16  ;;  %v1100_v51 = vld [vmem:[%s1362_s0 + $0x1a8] sm:$0xff]  ;;  %57 = vperm.xlu0 %1112, %v17_v48   ;;  %v1107_v56 = vld [vmem:[%s1362_s0 + $0x1e0] sm:$0xff]  ;;  %v1082_v57 = vld [vmem:[%s1362_s0 + $0x118] sm:$0xff] }
  0x13   :  { %184 = vmatpush.bf16.msra.mxu1 %v1058_v17  ;;  %v1108_v52 = vld [vmem:[%s1362_s0 + $0x1e8] sm:$0xff]  ;;  %v1090_v58 = vld [vmem:[%s1362_s0 + $0x158] sm:$0xff]  ;;  %v1081_v61 = vld [vmem:[%s1362_s0 + $0x110] sm:$0xff] }
  0x14   :  { %329 = vmatpush.bf16.msra.mxu2 %v1066_v18  ;;  %v1098_v59 = vld [vmem:[%s1362_s0 + $0x198] sm:$0xff]  ;;  %v1089_v62 = vld [vmem:[%s1362_s0 + $0x150] sm:$0xff]  ;;  %v1080_v1 = vld [vmem:[%s1362_s0 + $0x108] sm:$0xff] }
  0x15   :  { %343 = vmatpush.bf16.msra.mxu3 %v1074_v19  ;;  %v1106_v60 = vld [vmem:[%s1362_s0 + $0x1d8] sm:$0xff]  ;;  %v1097_v63 = vld [vmem:[%s1362_s0 + $0x190] sm:$0xff]  ;;  %v1088_v2 = vld [vmem:[%s1362_s0 + $0x148] sm:$0xff] }
  0x16   :  { %171 = vmatpush.bf16.msra.mxu0 %v1049_v20  ;;  %v1105_v0 = vld [vmem:[%s1362_s0 + $0x1d0] sm:$0xff]  ;;  %v1096_v3 = vld [vmem:[%s1362_s0 + $0x188] sm:$0xff]  ;;  %v1079_v5 = vld [vmem:[%s1362_s0 + $0x100] sm:$0xff] }
  0x17   :  { %185 = vmatpush.bf16.msra.mxu1 %v1057_v21  ;;  %v1104_v4 = vld [vmem:[%s1362_s0 + $0x1c8] sm:$0xff]  ;;  %v1087_v6 = vld [vmem:[%s1362_s0 + $0x140] sm:$0xff] }
  0x18   :  { %330 = vmatpush.bf16.msra.mxu2 %v1065_v22  ;;  %v1095_v7 = vld [vmem:[%s1362_s0 + $0x180] sm:$0xff] }
  0x19   :  { %344 = vmatpush.bf16.msra.mxu3 %v1073_v23  ;;  %v1103_v8 = vld [vmem:[%s1362_s0 + $0x1c0] sm:$0xff] }
  0x1a   :  { %172 = vmatpush.bf16.msra.mxu0 %v1048_v24 }
  0x1b   :  { %186 = vmatpush.bf16.msra.mxu1 %v1056_v25 }
  0x1c   :  { %331 = vmatpush.bf16.msra.mxu2 %v1064_v27 }
  0x1d   :  { %345 = vmatpush.bf16.msra.mxu3 %v1072_v28 }
  0x1e   :  { %173 = vmatpush.bf16.msra.mxu0 %v1047_v30 }
  0x1f   :  { %187 = vmatpush.bf16.msra.mxu1 %v1055_v31 }
  0x20   :  { %332 = vmatpush.bf16.msra.mxu2 %v1063_v32 }
  0x21   :  { %346 = vmatpush.bf16.msra.mxu3 %v1071_v33  ;;  %174 = vmatmul.bf16.vlgmr.msra.gmra.mxu0 %v1257_v42 }
  0x22   :  { %486 = vmatpush.bf16.msrb.mxu0 %v1086_v38  ;;  %188 = vmatmul.bf16.vlgmr.msra.gmra.mxu1 %v1259_v43 }
  0x23   :  { %500 = vmatpush.bf16.msrb.mxu1 %v1094_v39  ;;  %333 = vmatmul.bf16.vlgmr.msra.gmra.mxu2 %v1257_v42 }
  0x24   :  { %647 = vmatpush.bf16.msrb.mxu2 %v1102_v40  ;;  %347 = vmatmul.bf16.vlgmr.msra.gmra.mxu3 %v1259_v43 }
  0x25   :  { %661 = vmatpush.bf16.msrb.mxu3 %v1110_v41 }
  0x26   :  { %487 = vmatpush.bf16.msrb.mxu0 %v1085_v44 }
  0x27   :  { %501 = vmatpush.bf16.msrb.mxu1 %v1093_v45 }
  0x28   :  { %648 = vmatpush.bf16.msrb.mxu2 %v1101_v46 }
  0x29   :  { %662 = vmatpush.bf16.msrb.mxu3 %v1109_v47 }
  0x2a   :  { %488 = vmatpush.bf16.msrb.mxu0 %v1084_v49 }
  0x2b   :  { %502 = vmatpush.bf16.msrb.mxu1 %v1092_v50 }
  0x2c   :  { %649 = vmatpush.bf16.msrb.mxu2 %v1100_v51 }
  0x2d   :  { %663 = vmatpush.bf16.msrb.mxu3 %v1108_v52 }
  0x2e   :  { %489 = vmatpush.bf16.msrb.mxu0 %v1083_v53 }
  0x2f   :  { %503 = vmatpush.bf16.msrb.mxu1 %v1091_v54 }
  0x30   :  { %650 = vmatpush.bf16.msrb.mxu2 %v1099_v55 }
  0x31   :  { %664 = vmatpush.bf16.msrb.mxu3 %v1107_v56 }
  0x32   :  { %490 = vmatpush.bf16.msrb.mxu0 %v1082_v57 }
  0x33   :  { %504 = vmatpush.bf16.msrb.mxu1 %v1090_v58 }
  0x34   :  { %651 = vmatpush.bf16.msrb.mxu2 %v1098_v59 }
  0x35   :  { %665 = vmatpush.bf16.msrb.mxu3 %v1106_v60 }
  0x36   :  { %491 = vmatpush.bf16.msrb.mxu0 %v1081_v61 }
  0x37   :  { %505 = vmatpush.bf16.msrb.mxu1 %v1089_v62 }
  0x38   :  { %652 = vmatpush.bf16.msrb.mxu2 %v1097_v63 }
  0x39   :  { %666 = vmatpush.bf16.msrb.mxu3 %v1105_v0 }
  0x3a   :  { %492 = vmatpush.bf16.msrb.mxu0 %v1080_v1 }
  0x3b   :  { %506 = vmatpush.bf16.msrb.mxu1 %v1088_v2 }
  0x3c   :  { %653 = vmatpush.bf16.msrb.mxu2 %v1096_v3 }
  0x3d   :  { %667 = vmatpush.bf16.msrb.mxu3 %v1104_v4 }
  0x3e   :  { %493 = vmatpush.bf16.msrb.mxu0 %v1079_v5 }
  0x3f   :  { %507 = vmatpush.bf16.msrb.mxu1 %v1087_v6 }
  0x40   :  { %654 = vmatpush.bf16.msrb.mxu2 %v1095_v7 }
  0x41   :  { %668 = vmatpush.bf16.msrb.mxu3 %v1103_v8  ;;  %494 = vmatmul.bf16.vlgmr.msrb.gmra.mxu0 %v1257_v42 }
  0x42   :  { %508 = vmatmul.bf16.vlgmr.msrb.gmra.mxu1 %v1259_v43 }
  0x43   :  { %655 = vmatmul.bf16.vlgmr.msrb.gmra.mxu2 %v1257_v42 }
  0x44   :  { %669 = vmatmul.bf16.vlgmr.msrb.gmra.mxu3 %v1259_v43 }
  0x7c   :  { %v53_v14 = vpop.permute.xlu0 %52 }
  0x84   :  { %v58_v25 = vpop.permute.xlu0 %57 }
  0x9e   :  { %v175_v9 = vpop.f32.mrf.mxu0 }
  0x9f   :  { %v189_v10 = vpop.f32.mrf.mxu1  ;;  %v176_v16 = vadd.f32 %v175_v9, %v53_v14 }
  0xa1   :  { %v190_v23 = vadd.f32 %v189_v10, %v176_v16 }
  0xa3   :  { %v194_v27 = vmax.f32 %v190_v23, 0.0 }
  0xa6   :  { %v334_v11 = vpop.f32.mrf.mxu2  ;;  %v177_v13 = vpop.f32.mrf.mxu0 }
  0xa7   :  { %v348_v12 = vpop.f32.mrf.mxu3  ;;  %v191_v15 = vpop.f32.mrf.mxu1  ;;  %v335_v17 = vadd.f32 %v334_v11, %v53_v14  ;;  %v178_v29 = vadd.f32 %v177_v13, %v58_v25 }
  0xa9   :  { %v349_v24 = vadd.f32 %v348_v12, %v335_v17  ;;  %v192_v38 = vadd.f32 %v191_v15, %v178_v29 }
  0xab   :  { %v353_v28 = vmax.f32 %v349_v24, 0.0  ;;  %v195_v45 = vmax.f32 %v192_v38, 0.0 }
  0xad   :  { %v355_v37 = vmax.f32 %v194_v27, %v353_v28 }
  0xae   :  { %v336_v18 = vpop.f32.mrf.mxu2 }
  0xaf   :  { %v350_v19 = vpop.f32.mrf.mxu3  ;;  %v337_v30 = vadd.f32 %v336_v18, %v58_v25 }
  0xb1   :  { %v351_v39 = vadd.f32 %v350_v19, %v337_v30 }
  0xb3   :  { %v354_v46 = vmax.f32 %v351_v39, 0.0 }
  0xb5   :  { %v356_v52 = vmax.f32 %v195_v45, %v354_v46 }
  0xbe   :  { %v495_v20 = vpop.f32.mrf.mxu0 }
  0xbf   :  { %v496_v21 = vadd.f32 %v495_v20, %v53_v14  ;;  %v509_v22 = vpop.f32.mrf.mxu1 }
  0xc1   :  { %v510_v26 = vadd.f32 %v509_v22, %v496_v21 }
  0xc3   :  { %v514_v33 = vmax.f32 %v510_v26, 0.0 }
  0xc5   :  { %v516_v42 = vmax.f32 %v355_v37, %v514_v33 }
  0xc6   :  { %v656_v31 = vpop.f32.mrf.mxu2  ;;  %v497_v35 = vpop.f32.mrf.mxu0 }
  0xc7   :  { %v670_v32 = vpop.f32.mrf.mxu3  ;;  %v657_v34 = vadd.f32 %v656_v31, %v53_v14  ;;  %v498_v36 = vadd.f32 %v497_v35, %v58_v25  ;;  %v511_v41 = vpop.f32.mrf.mxu1 }
  0xc9   :  { %v671_v40 = vadd.f32 %v670_v32, %v657_v34  ;;  %v512_v44 = vadd.f32 %v511_v41, %v498_v36 }
  0xcb   :  { %v675_v43 = vmax.f32 %v671_v40, 0.0  ;;  %v515_v49 = vmax.f32 %v512_v44, 0.0 }
  0xcd   :  { %v677_v47 = vmax.f32 %v516_v42, %v675_v43  ;;  %v517_v54 = vmax.f32 %v356_v52, %v515_v49 }
  0xce   :  { %v658_v48 = vpop.f32.mrf.mxu2 }
  0xcf   :  { %679 = vst [vmem:[%s1365_s3] sm:$0xff] %v677_v47  ;;  %v659_v50 = vadd.f32 %v658_v48, %v58_v25  ;;  %v672_v51 = vpop.f32.mrf.mxu3 }
  0xd1   :  { %v673_v53 = vadd.f32 %v672_v51, %v659_v50 }
  0xd3   :  { %v676_v55 = vmax.f32 %v673_v53, 0.0 }
  0xd5   :  { %v678_v56 = vmax.f32 %v517_v54, %v676_v55 }
  0xd7   :  { %680 = vst [vmem:[%s1365_s3 + $0x8] sm:$0xff] %v678_v56 }

// kernel: convnet_simple_forward.5
= control target key start
LH: loop header
LB: loop body
LE: loop exit
PB: predicated region body
PF: predicated region fallthrough
CT: control target
= control target key end

     0   :  { %s970_s1 = inlined_call_operand.vmem [shape: bf16[512,128], index: 1, kind: input, shape index: {}]   ;;  %s971_s2 = inlined_call_operand.vmem [shape: f32[1,128], index: 2, kind: input, shape index: {}]   ;;  %s972_s0 = inlined_call_operand.vmem [shape: bf16[8,512], index: 0, kind: input, shape index: {}]   ;;  %s973_s3 = inlined_call_operand.vmem [shape: bf16[128,128], index: 3, kind: input, shape index: {}]   ;;  %s974_s4 = inlined_call_operand.vmem [shape: f32[1,128], index: 4, kind: input, shape index: {}]   ;;  %s975_s5 = inlined_call_operand.vmem [shape: bf16[128,128], index: 5, kind: input, shape index: {}]   ;;  %s976_s6 = inlined_call_operand.vmem [shape: f32[1,128], index: 6, kind: input, shape index: {}]   ;;  %s977_s7 = inlined_call_operand.vmem [shape: f32[8,128], index: 7, kind: output, shape index: {}]  }
   0x1   :  { %v724_v0 = vld [vmem:[%s970_s1 + $0x38] sm:$0xff]  ;;  %v723_v4 = vld [vmem:[%s970_s1 + $0x30] sm:$0xff]  ;;  %v722_v8 = vld [vmem:[%s970_s1 + $0x28] sm:$0xff] }
   0x2   :  { %v732_v1 = vld [vmem:[%s970_s1 + $0x78] sm:$0xff]  ;;  %302 = vmatpush.bf16.msra.mxu0 %v724_v0  ;;  %v731_v5 = vld [vmem:[%s970_s1 + $0x70] sm:$0xff]  ;;  %v730_v9 = vld [vmem:[%s970_s1 + $0x68] sm:$0xff] }
   0x3   :  { %v740_v2 = vld [vmem:[%s970_s1 + $0xb8] sm:$0xff]  ;;  %315 = vmatpush.bf16.msra.mxu1 %v732_v1  ;;  %v739_v6 = vld [vmem:[%s970_s1 + $0xb0] sm:$0xff]  ;;  %v738_v10 = vld [vmem:[%s970_s1 + $0xa8] sm:$0xff] }
   0x4   :  { %v748_v3 = vld [vmem:[%s970_s1 + $0xf8] sm:$0xff]  ;;  %328 = vmatpush.bf16.msra.mxu2 %v740_v2  ;;  %v747_v7 = vld [vmem:[%s970_s1 + $0xf0] sm:$0xff]  ;;  %v746_v11 = vld [vmem:[%s970_s1 + $0xe8] sm:$0xff] }
   0x5   :  { %341 = vmatpush.bf16.msra.mxu3 %v748_v3  ;;  %v721_v12 = vld [vmem:[%s970_s1 + $0x20] sm:$0xff]  ;;  %v720_v16 = vld [vmem:[%s970_s1 + $0x18] sm:$0xff]  ;;  %v719_v20 = vld [vmem:[%s970_s1 + $0x10] sm:$0xff] }
   0x6   :  { %303 = vmatpush.bf16.msra.mxu0 %v723_v4  ;;  %v729_v13 = vld [vmem:[%s970_s1 + $0x60] sm:$0xff]  ;;  %v728_v17 = vld [vmem:[%s970_s1 + $0x58] sm:$0xff]  ;;  %v727_v21 = vld [vmem:[%s970_s1 + $0x50] sm:$0xff] }
   0x7   :  { %316 = vmatpush.bf16.msra.mxu1 %v731_v5  ;;  %v737_v14 = vld [vmem:[%s970_s1 + $0xa0] sm:$0xff]  ;;  %v736_v18 = vld [vmem:[%s970_s1 + $0x98] sm:$0xff]  ;;  %v735_v22 = vld [vmem:[%s970_s1 + $0x90] sm:$0xff] }
   0x8   :  { %329 = vmatpush.bf16.msra.mxu2 %v739_v6  ;;  %v745_v15 = vld [vmem:[%s970_s1 + $0xe0] sm:$0xff]  ;;  %v744_v19 = vld [vmem:[%s970_s1 + $0xd8] sm:$0xff]  ;;  %v743_v23 = vld [vmem:[%s970_s1 + $0xd0] sm:$0xff] }
   0x9   :  { %342 = vmatpush.bf16.msra.mxu3 %v747_v7  ;;  %v718_v24 = vld [vmem:[%s970_s1 + $0x8] sm:$0xff]  ;;  %v26_v26 = vld [vmem:[%s972_s0] sm:$0xff]  ;;  %v756_v38 = vld [vmem:[%s973_s3 + $0x38] sm:$0xff] }
   0xa   :  { %304 = vmatpush.bf16.msra.mxu0 %v722_v8  ;;  %v726_v25 = vld [vmem:[%s970_s1 + $0x48] sm:$0xff]  ;;  %v98_v30 = vunpack.c.l.b16 %v26_v26  ;;  %v99_v31 = vunpack.c.h.b16 %v26_v26  ;;  %v717_v32 = vld [vmem:[%s970_s1] sm:$0xff]  ;;  %v755_v43 = vld [vmem:[%s973_s3 + $0x30] sm:$0xff] }
   0xb   :  { %317 = vmatpush.bf16.msra.mxu1 %v730_v9  ;;  %v734_v27 = vld [vmem:[%s970_s1 + $0x88] sm:$0xff]  ;;  %v725_v33 = vld [vmem:[%s970_s1 + $0x40] sm:$0xff]  ;;  %v752_v46 = vld [vmem:[%s973_s3 + $0x18] sm:$0xff] }
   0xc   :  { %330 = vmatpush.bf16.msra.mxu2 %v738_v10  ;;  %v742_v28 = vld [vmem:[%s970_s1 + $0xc8] sm:$0xff]  ;;  %v733_v36 = vld [vmem:[%s970_s1 + $0x80] sm:$0xff]  ;;  %v102_v39 = vpack.c.b16 %v98_v30, %v98_v30  ;;  %v103_v40 = vpack.c.b16 %v99_v31, %v99_v31  ;;  %v751_v47 = vld [vmem:[%s973_s3 + $0x10] sm:$0xff] }
   0xd   :  { %343 = vmatpush.bf16.msra.mxu3 %v746_v11  ;;  %v27_v29 = vld [vmem:[%s972_s0 + $0x8] sm:$0xff]  ;;  %v741_v37 = vld [vmem:[%s970_s1 + $0xc0] sm:$0xff]  ;;  %v764_v50 = vld [vmem:[%s975_s5 + $0x38] sm:$0xff] }
   0xe   :  { %305 = vmatpush.bf16.msra.mxu0 %v721_v12  ;;  %v100_v34 = vunpack.c.l.b16 %v27_v29  ;;  %v101_v35 = vunpack.c.h.b16 %v27_v29  ;;  %v754_v44 = vld [vmem:[%s973_s3 + $0x28] sm:$0xff]  ;;  %v753_v45 = vld [vmem:[%s973_s3 + $0x20] sm:$0xff]  ;;  %v763_v51 = vld [vmem:[%s975_s5 + $0x30] sm:$0xff] }
   0xf   :  { %318 = vmatpush.bf16.msra.mxu1 %v729_v13  ;;  %v750_v48 = vld [vmem:[%s973_s3 + $0x8] sm:$0xff]  ;;  %v749_v49 = vld [vmem:[%s973_s3] sm:$0xff]  ;;  %v760_v55 = vld [vmem:[%s975_s5 + $0x18] sm:$0xff] }
  0x10   :  { %331 = vmatpush.bf16.msra.mxu2 %v737_v14  ;;  %v104_v41 = vpack.c.b16 %v100_v34, %v100_v34  ;;  %v105_v42 = vpack.c.b16 %v101_v35, %v101_v35  ;;  %v762_v52 = vld [vmem:[%s975_s5 + $0x28] sm:$0xff]  ;;  %v761_v53 = vld [vmem:[%s975_s5 + $0x20] sm:$0xff]  ;;  %v759_v59 = vld [vmem:[%s975_s5 + $0x10] sm:$0xff] }
  0x11   :  { %344 = vmatpush.bf16.msra.mxu3 %v745_v15  ;;  %v765_v54 = vld [vmem:[%s971_s2] ss:$0 sm:$0xff]  ;;  %v758_v7 = vld [vmem:[%s975_s5 + $0x8] sm:$0xff] }
  0x12   :  { %306 = vmatpush.bf16.msra.mxu0 %v720_v16  ;;  %v757_v8 = vld [vmem:[%s975_s5] sm:$0xff] }
  0x13   :  { %319 = vmatpush.bf16.msra.mxu1 %v728_v17  ;;  %v766_v9 = vld [vmem:[%s974_s4] ss:$0 sm:$0xff] }
  0x14   :  { %332 = vmatpush.bf16.msra.mxu2 %v736_v18  ;;  %v767_v15 = vld [vmem:[%s976_s6] ss:$0 sm:$0xff] }
  0x15   :  { %345 = vmatpush.bf16.msra.mxu3 %v744_v19 }
  0x16   :  { %307 = vmatpush.bf16.msra.mxu0 %v719_v20 }
  0x17   :  { %320 = vmatpush.bf16.msra.mxu1 %v727_v21 }
  0x18   :  { %333 = vmatpush.bf16.msra.mxu2 %v735_v22 }
  0x19   :  { %346 = vmatpush.bf16.msra.mxu3 %v743_v23 }
  0x1a   :  { %308 = vmatpush.bf16.msra.mxu0 %v718_v24 }
  0x1b   :  { %321 = vmatpush.bf16.msra.mxu1 %v726_v25 }
  0x1c   :  { %334 = vmatpush.bf16.msra.mxu2 %v734_v27 }
  0x1d   :  { %347 = vmatpush.bf16.msra.mxu3 %v742_v28 }
  0x1e   :  { %309 = vmatpush.bf16.msra.mxu0 %v717_v32 }
  0x1f   :  { %322 = vmatpush.bf16.msra.mxu1 %v725_v33 }
  0x20   :  { %335 = vmatpush.bf16.msra.mxu2 %v733_v36 }
  0x21   :  { %348 = vmatpush.bf16.msra.mxu3 %v741_v37  ;;  %310 = vmatmul.bf16.vlgmr.msra.gmra.mxu0 %v102_v39 }
  0x22   :  { %424 = vmatpush.bf16.msrb.mxu0 %v756_v38  ;;  %323 = vmatmul.bf16.vlgmr.msra.gmra.mxu1 %v103_v40 }
  0x23   :  { %336 = vmatmul.bf16.vlgmr.msra.gmra.mxu2 %v104_v41  ;;  %507 = vmatpush.bf16.msrb.mxu1 %v764_v50 }
  0x24   :  { %349 = vmatmul.bf16.vlgmr.msra.gmra.mxu3 %v105_v42 }
  0x26   :  { %425 = vmatpush.bf16.msrb.mxu0 %v755_v43 }
  0x27   :  { %508 = vmatpush.bf16.msrb.mxu1 %v763_v51 }
  0x2a   :  { %426 = vmatpush.bf16.msrb.mxu0 %v754_v44 }
  0x2b   :  { %509 = vmatpush.bf16.msrb.mxu1 %v762_v52 }
  0x2e   :  { %427 = vmatpush.bf16.msrb.mxu0 %v753_v45 }
  0x2f   :  { %510 = vmatpush.bf16.msrb.mxu1 %v761_v53 }
  0x32   :  { %428 = vmatpush.bf16.msrb.mxu0 %v752_v46 }
  0x33   :  { %511 = vmatpush.bf16.msrb.mxu1 %v760_v55 }
  0x36   :  { %429 = vmatpush.bf16.msrb.mxu0 %v751_v47 }
  0x37   :  { %512 = vmatpush.bf16.msrb.mxu1 %v759_v59 }
  0x3a   :  { %430 = vmatpush.bf16.msrb.mxu0 %v750_v48 }
  0x3b   :  { %513 = vmatpush.bf16.msrb.mxu1 %v758_v7 }
  0x3e   :  { %431 = vmatpush.bf16.msrb.mxu0 %v749_v49 }
  0x3f   :  { %514 = vmatpush.bf16.msrb.mxu1 %v757_v8 }
  0x9e   :  { %v311_v56 = vpop.f32.mrf.mxu0 }
  0x9f   :  { %v324_v57 = vpop.f32.mrf.mxu1  ;;  %v312_v58 = vadd.f32 %v765_v54, %v311_v56 }
  0xa1   :  { %v325_v60 = vadd.f32 %v324_v57, %v312_v58 }
  0xa6   :  { %v337_v61 = vpop.f32.mrf.mxu2  ;;  %v313_v0 = vpop.f32.mrf.mxu0 }
  0xa7   :  { %v350_v62 = vpop.f32.mrf.mxu3  ;;  %v338_v63 = vadd.f32 %v337_v61, %v325_v60  ;;  %v326_v1 = vpop.f32.mrf.mxu1 }
  0xa9   :  { %v351_v2 = vadd.f32 %v350_v62, %v338_v63 }
  0xab   :  { %v354_v3 = vmax.f32 %v351_v2, 0.0 }
  0xad   :  { %v355_v4 = vpack.c.bf16 %v354_v3, %v354_v3 }
  0xae   :  { %v339_v5 = vpop.f32.mrf.mxu2 }
  0xaf   :  { %v352_v6 = vpop.f32.mrf.mxu3  ;;  %432 = vmatmul.bf16.vlgmr.msrb.gmra.mxu0 %v355_v4 }
 0x12c   :  { %v433_v10 = vpop.f32.mrf.mxu0 }
 0x12d   :  { %v434_v11 = vadd.f32 %v766_v9, %v433_v10 }
 0x12f   :  { %v437_v12 = vmax.f32 %v434_v11, 0.0 }
 0x131   :  { %v438_v13 = vpack.c.bf16 %v437_v12, %v437_v12 }
 0x133   :  { %515 = vmatmul.bf16.vlgmr.msrb.gmra.mxu1 %v438_v13 }
 0x134   :  { %v435_v14 = vpop.f32.mrf.mxu0 }
 0x1b0   :  { %v516_v16 = vpop.f32.mrf.mxu1 }
 0x1b1   :  { %v517_v17 = vadd.f32 %v767_v15, %v516_v16 }
 0x1b3   :  { %520 = vst [vmem:[%s977_s7] sm:$0xff] %v517_v17 }
 0x1b8   :  { %v518_v18 = vpop.f32.mrf.mxu1 }

</bundles_post_ra>
